<compile_context>
chip_gen: v5e
topology: v5e:2x2
jax: 0.10.0
libtpu: 0.0.40
codegen_flags: <defaults>
</compile_context>

<pallas_src>
import functools

import jax
import jax.numpy as jnp
from jax.experimental import pallas as pl
from jax.experimental.pallas import tpu as pltpu

EPS = 1e-5
EXPANSION = 4
LANE = 128

_PARALLEL = pltpu.CompilerParams(
    dimension_semantics=("parallel",),
    vmem_limit_bytes=32 * 1024 * 1024,
)


def _round_up(x, m):
    return (x + m - 1) // m * m


def _cdiv(a, b):
    return (a + b - 1) // b


# ----------------------------- Pallas kernels ------------------------------ #

def _row_valid(tile_rows, m_true):
    """(tile_rows, 1) mask of rows belonging to the un-padded row range."""
    row = (pl.program_id(0) * tile_rows
           + jax.lax.broadcasted_iota(jnp.int32, (tile_rows, 1), 0))
    return row < m_true


def _write_stats(st_ref, h_f32, tile_rows, m_true):
    """Per-tile partial (sum, sum_sq) over rows; partial-tile rows masked."""
    if m_true % tile_rows:
        h_f32 = jnp.where(_row_valid(tile_rows, m_true), h_f32, 0.0)
    st_ref[0, pl.ds(0, 1), :] = jnp.sum(h_f32, axis=0, keepdims=True)
    st_ref[0, pl.ds(1, 1), :] = jnp.sum(h_f32 * h_f32, axis=0, keepdims=True)


def _pw_dual_kernel(x_ref, w1_ref, ws_ref, h1_ref, sc_ref, st1_ref, sts_ref,
                    *, m_true):
    """conv1 (1x1) and projection-shortcut (1x1) on the same x tile.

    x is read from HBM once and feeds both matmuls; bf16 raw outputs and
    per-tile partial (sum, sum_sq) stats (from the bf16-rounded values) are
    written.
    """
    tm = x_ref.shape[0]
    x = x_ref[...]                                            # (TM, Cin_p) bf16
    h1 = jnp.dot(x, w1_ref[...], preferred_element_type=jnp.float32)
    sc = jnp.dot(x, ws_ref[...], preferred_element_type=jnp.float32)
    h1b = h1.astype(jnp.bfloat16)
    scb = sc.astype(jnp.bfloat16)
    h1_ref[...] = h1b
    sc_ref[...] = scb
    _write_stats(st1_ref, h1b.astype(jnp.float32), tm, m_true)
    _write_stats(sts_ref, scb.astype(jnp.float32), tm, m_true)


def _pw_plain_kernel(x_ref, w_ref, h_ref, st_ref, *, m_true):
    """Plain 1x1 conv (bf16 in / bf16 out) - identity-shortcut conv1 path."""
    tm = x_ref.shape[0]
    h = jnp.dot(x_ref[...], w_ref[...], preferred_element_type=jnp.float32)
    hb = h.astype(jnp.bfloat16)
    h_ref[...] = hb
    _write_stats(st_ref, hb.astype(jnp.float32), tm, m_true)


def _pw_norm_kernel(x_ref, scale_ref, shift_ref, w_ref, h_ref, st_ref, *,
                    m_true, input_relu):
    """1x1 conv with the previous layer's BN(+ReLU) fused into the input read."""
    tm = x_ref.shape[0]
    x = x_ref[...].astype(jnp.float32) * scale_ref[...] + shift_ref[...]
    if input_relu:
        x = jnp.maximum(x, 0.0)
    h = jnp.dot(x.astype(jnp.bfloat16), w_ref[...],
                preferred_element_type=jnp.float32)
    hb = h.astype(jnp.bfloat16)
    h_ref[...] = hb
    _write_stats(st_ref, hb.astype(jnp.float32), tm, m_true)


def _conv3x3_kernel(h1_ref, scale_ref, shift_ref, w2_ref, h2_ref, st_ref,
                    pad_ref):
    """3x3 conv (pad=1, stride=1) for one image, BN1+ReLU fused on the input.

    The normalized input is zero-padded (one concat + one aligned full store)
    into a VMEM halo scratch; the conv is 9 whole-image shifted
    (Ho*Wo, C) x (C, C2) matmuls accumulated in f32 (no per-row mini-matmuls,
    no per-iteration full-scratch zeroing).
    """
    _, Ho, Wo, C = h1_ref.shape
    C2 = h2_ref.shape[3]

    # BN1 + ReLU on the raw conv1 activations (padding must follow the norm).
    xn = jnp.maximum(
        h1_ref[0].astype(jnp.float32) * scale_ref[...] + shift_ref[...], 0.0)
    zcol = jnp.zeros((Ho, 1, C), jnp.float32)
    zrow = jnp.zeros((1, Wo + 2, C), jnp.float32)
    pad_ref[...] = jnp.concatenate(
        [zrow, jnp.concatenate([zcol, xn, zcol], axis=1), zrow], axis=0)

    acc = jnp.zeros((Ho * Wo, C2), jnp.float32)
    for dh in range(3):
        for dw in range(3):
            win = pad_ref[pl.ds(dh, Ho), pl.ds(dw, Wo), :]
            win = win.reshape(Ho * Wo, C).astype(jnp.bfloat16)
            acc = acc + jnp.dot(win, w2_ref[dh * 3 + dw],
                                preferred_element_type=jnp.float32)

    # bf16-rounded values used both for the stored output and the stats.
    hf = acc.astype(jnp.bfloat16).astype(jnp.float32)
    h2_ref[...] = hf.reshape(1, Ho, Wo, C2).astype(jnp.bfloat16)
    st_ref[0, pl.ds(0, 1), :] = jnp.sum(hf, axis=0, keepdims=True)
    st_ref[0, pl.ds(1, 1), :] = jnp.sum(hf * hf, axis=0, keepdims=True)


def _epilogue_kernel(h3_ref, sc_ref, s3_ref, b3_ref, ss_ref, bs_ref, o_ref):
    """out = relu(BN3(h3_raw) + BN_shortcut(sc_raw)) -- fused epilogue."""
    y = h3_ref[...].astype(jnp.float32) * s3_ref[...] + b3_ref[...]
    z = sc_ref[...].astype(jnp.float32) * ss_ref[...] + bs_ref[...]
    o_ref[...] = jnp.maximum(y + z, 0.0)


# --------------------------- kernel call wrappers --------------------------- #

def _pick_row_tile(m, bytes_per_row, *, budget=20 << 20, cap=1024, min_steps=4):
    """Row tile: multiple of 8, double-buffered blocks fit `budget` bytes of
    VMEM (safe under v5e's 16 MiB / v7x's 32 MiB scoped defaults once the
    explicit 32 MiB limit is set), <= cap, and small enough to leave at least
    `min_steps` grid steps so both v7x TensorCores get work and BlockSpec can
    double-buffer."""
    by_vmem = max(8, budget // (2 * max(bytes_per_row, 1)) // 8 * 8)
    by_steps = _round_up(max(_cdiv(m, min_steps), 8), 8)
    return int(min(by_vmem, cap, by_steps))


def _mt(tm, c):
    return pl.BlockSpec((tm, c), lambda i: (i, 0))


def _bc(shape):
    nd = len(shape)
    return pl.BlockSpec(shape, lambda i: (0,) * nd)


def _st(c):
    return pl.BlockSpec((1, 2, c), lambda i: (i, 0, 0))


def _conv1_and_shortcut(x_bf16, w1, ws, tm):
    M, cin_p = x_bf16.shape
    cmid_p = w1.shape[1]
    cexp_p = ws.shape[1]
    nt = _cdiv(M, tm)
    kern = functools.partial(_pw_dual_kernel, m_true=M)
    return pl.pallas_call(
        kern,
        grid=(nt,),
        in_specs=(_mt(tm, cin_p), _bc((cin_p, cmid_p)), _bc((cin_p, cexp_p))),
        out_specs=(_mt(tm, cmid_p), _mt(tm, cexp_p), _st(cmid_p), _st(cexp_p)),
        out_shape=(jax.ShapeDtypeStruct((M, cmid_p), jnp.bfloat16),
                   jax.ShapeDtypeStruct((M, cexp_p), jnp.bfloat16),
                   jax.ShapeDtypeStruct((nt, 2, cmid_p), jnp.float32),
                   jax.ShapeDtypeStruct((nt, 2, cexp_p), jnp.float32)),
        compiler_params=_PARALLEL,
    )(x_bf16, w1, ws)


def _pw_plain(x_bf16, w, tm):
    M, K = x_bf16.shape
    C = w.shape[1]
    nt = _cdiv(M, tm)
    kern = functools.partial(_pw_plain_kernel, m_true=M)
    return pl.pallas_call(
        kern,
        grid=(nt,),
        in_specs=(_mt(tm, K), _bc((K, C))),
        out_specs=(_mt(tm, C), _st(C)),
        out_shape=(jax.ShapeDtypeStruct((M, C), jnp.bfloat16),
                   jax.ShapeDtypeStruct((nt, 2, C), jnp.float32)),
        compiler_params=_PARALLEL,
    )(x_bf16, w)


def _pw_conv(x, scale, shift, w, tm, *, input_relu):
    M, K = x.shape
    C = w.shape[1]
    nt = _cdiv(M, tm)
    kern = functools.partial(_pw_norm_kernel, m_true=M, input_relu=input_relu)
    return pl.pallas_call(
        kern,
        grid=(nt,),
        in_specs=(_mt(tm, K), _bc((1, K)), _bc((1, K)), _bc((K, C))),
        out_specs=(_mt(tm, C), _st(C)),
        out_shape=(jax.ShapeDtypeStruct((M, C), jnp.bfloat16),
                   jax.ShapeDtypeStruct((nt, 2, C), jnp.float32)),
        compiler_params=_PARALLEL,
    )(x, scale, shift, w)


def _conv3x3(h1_img, scale1, shift1, w2):
    # TODO(synk): for v7x with tiny batch (N < 2), additionally split this
    # grid over output-row bands with a 1-row halo so both TensorCores stay
    # busy; at N >= 2 the per-image grid already feeds both cores.
    N, Ho, Wo, cmid_p = h1_img.shape
    c2 = w2.shape[2]
    return pl.pallas_call(
        _conv3x3_kernel,
        grid=(N,),
        in_specs=(pl.BlockSpec((1, Ho, Wo, cmid_p), lambda n: (n, 0, 0, 0)),
                  pl.BlockSpec((1, 1, cmid_p), lambda n: (0, 0, 0)),
                  pl.BlockSpec((1, 1, cmid_p), lambda n: (0, 0, 0)),
                  pl.BlockSpec((9, cmid_p, c2), lambda n: (0, 0, 0))),
        out_specs=(pl.BlockSpec((1, Ho, Wo, c2), lambda n: (n, 0, 0, 0)),
                   pl.BlockSpec((1, 2, c2), lambda n: (n, 0, 0))),
        out_shape=(jax.ShapeDtypeStruct((N, Ho, Wo, c2), jnp.bfloat16),
                   jax.ShapeDtypeStruct((N, 2, c2), jnp.float32)),
        scratch_shapes=[pltpu.VMEM((Ho + 2, Wo + 2, cmid_p), jnp.float32)],
        compiler_params=_PARALLEL,
    )(h1_img, scale1.reshape(1, 1, cmid_p), shift1.reshape(1, 1, cmid_p), w2)


def _residual_epilogue(h3, sc, s3, b3, s_s, b_s, tm):
    M, cexp_p = h3.shape
    nt = _cdiv(M, tm)
    return pl.pallas_call(
        _epilogue_kernel,
        grid=(nt,),
        in_specs=(_mt(tm, cexp_p), _mt(tm, cexp_p),
                  _bc((1, cexp_p)), _bc((1, cexp_p)),
                  _bc((1, cexp_p)), _bc((1, cexp_p))),
        out_specs=_mt(tm, cexp_p),
        out_shape=jax.ShapeDtypeStruct((M, cexp_p), jnp.float32),
        compiler_params=_PARALLEL,
    )(h3, sc, s3, b3, s_s, b_s)


# ------------------------------- glue (JAX) -------------------------------- #

def _fold_bn(stats, m, gamma_p, beta_p):
    """Reduce per-tile partial (sum, sumsq) and fold BN into scale/shift."""
    s = jnp.sum(stats[:, 0, :], axis=0, keepdims=True)          # (1, C)
    ss = jnp.sum(stats[:, 1, :], axis=0, keepdims=True)
    mean = s / m
    var = jnp.maximum(ss / m - mean * mean, 0.0)                 # biased var
    rstd = jax.lax.rsqrt(var + EPS)
    scale = gamma_p * rstd
    shift = beta_p - mean * scale
    return scale, shift


def init_params(key, in_channels, out_channels):
    """Synthetic params. Weights are stored padded to 128 channels, in bf16.

    Conv biases are omitted: a per-channel bias before training-mode BN is
    exactly cancelled by the batch-mean subtraction, so the forward output is
    identical to the biased reference.
    """
    c_mid = out_channels
    c_exp = out_channels * EXPANSION
    cin_p = _round_up(in_channels, LANE)
    cmid_p = _round_up(c_mid, LANE)
    cexp_p = _round_up(c_exp, LANE)
    ks = jax.random.split(key, 4)

    def pad2(w, r, c):
        return jnp.pad(w, ((0, r - w.shape[0]), (0, c - w.shape[1]))
                       ).astype(jnp.bfloat16)

    w1 = jax.random.normal(ks[0], (in_channels, c_mid), jnp.float32) * 0.1
    w2 = jax.random.normal(ks[1], (9, c_mid, c_mid), jnp.float32) * 0.05
    w3 = jax.random.normal(ks[2], (c_mid, c_exp), jnp.float32) * 0.1
    ws = jax.random.normal(ks[3], (in_channels, c_exp), jnp.float32) * 0.1
    w2_p = jnp.pad(w2, ((0, 0), (0, cmid_p - c_mid), (0, cmid_p - c_mid))
                   ).astype(jnp.bfloat16)

    def bn(c, cp):    # gamma=1 / beta=0 on real channels, 0 on padded channels
        g = jnp.pad(jnp.ones((1, c), jnp.float32), ((0, 0), (0, cp - c)))
        b = jnp.zeros((1, cp), jnp.float32)
        return g, b

    g1, be1 = bn(c_mid, cmid_p)
    g2, be2 = bn(c_mid, cmid_p)
    g3, be3 = bn(c_exp, cexp_p)
    gs, bes = bn(c_exp, cexp_p)

    return {
        "w1": pad2(w1, cin_p, cmid_p), "w2": w2_p,
        "w3": pad2(w3, cmid_p, cexp_p), "ws": pad2(ws, cin_p, cexp_p),
        "g1": g1, "be1": be1, "g2": g2, "be2": be2,
        "g3": g3, "be3": be3, "gs": gs, "bes": bes,
    }


def block_neck_forward(x_nchw, params, *, in_channels, out_channels, stride):
    """BlockNeck forward. Input/output are NCHW like PyTorch."""
    c_mid = out_channels
    c_exp = out_channels * EXPANSION
    cin_p = _round_up(in_channels, LANE)
    cmid_p = _round_up(c_mid, LANE)
    cexp_p = _round_up(c_exp, LANE)

    # TODO(synk): the NCHW<->NHWC transposes, strided 1x1 sampling, channel
    # pad and bf16 cast are still XLA ops outside the kernels; folding them
    # into conv1's index_map (or accepting NHWC bf16 I/O) would remove the
    # remaining extra HBM passes over x / out.
    x = jnp.transpose(x_nchw, (0, 2, 3, 1)).astype(jnp.float32)   # NHWC
    x_s = x[:, ::stride, ::stride, :]
    N, Ho, Wo, _ = x_s.shape
    M = N * Ho * Wo
    x_flat = jnp.pad(x_s, ((0, 0), (0, 0), (0, 0),
                           (0, cin_p - in_channels)))
    x_flat = x_flat.reshape(M, cin_p).astype(jnp.bfloat16)

    proj = (stride != 1) or (in_channels != c_exp)

    # conv1 (1x1, stride) [+ projection shortcut]: bf16 raw outputs + stats.
    if proj:
        tm1 = _pick_row_tile(M, 2 * (cin_p + cmid_p + cexp_p))
        h1_raw, sc_raw, st1, sts = _conv1_and_shortcut(
            x_flat, params["w1"], params["ws"], tm1)
        scale_s, shift_s = _fold_bn(sts, M, params["gs"], params["bes"])
    else:
        tm1 = _pick_row_tile(M, 2 * (cin_p + cmid_p))
        h1_raw, st1 = _pw_plain(x_flat, params["w1"], tm1)
        sc_raw = x_flat                         # identity shortcut (bf16)
        scale_s = jnp.ones((1, cexp_p), jnp.float32)
        shift_s = jnp.zeros((1, cexp_p), jnp.float32)

    scale1, shift1 = _fold_bn(st1, M, params["g1"], params["be1"])

    # conv2 (3x3, pad=1) with BN1+ReLU fused on the input read.
    h2_img, st2 = _conv3x3(h1_raw.reshape(N, Ho, Wo, cmid_p),
                           scale1, shift1, params["w2"])
    scale2, shift2 = _fold_bn(st2, M, params["g2"], params["be2"])

    # conv3 (1x1) with BN2+ReLU fused on the input read.
    tm3 = _pick_row_tile(M, 2 * (cmid_p + cexp_p))
    h3_raw, st3 = _pw_conv(h2_img.reshape(M, cmid_p), scale2, shift2,
                           params["w3"], tm3, input_relu=True)
    scale3, shift3 = _fold_bn(st3, M, params["g3"], params["be3"])

    # fused BN3 + BN_shortcut + residual add + ReLU.
    tme = _pick_row_tile(M, 2 * cexp_p + 2 * cexp_p + 4 * cexp_p)
    out = _residual_epilogue(h3_raw, sc_raw, scale3, shift3, scale_s, shift_s,
                             tme)
    out = out.reshape(N, Ho, Wo, cexp_p)[..., :c_exp]
    return jnp.transpose(out, (0, 3, 1, 2))               # back to NCHW


# ---------------------------------- main ------------------------------------ #

if __name__ == "__main__":
    key = jax.random.PRNGKey(0)
    k_x, k_p = jax.random.split(key)

    N, in_channels, H, W = 2, 16, 16, 16
    out_channels, stride = 8, 2

    x = jax.random.normal(k_x, (N, in_channels, H, W), jnp.float32)
    params = init_params(k_p, in_channels, out_channels)

    fwd = jax.jit(functools.partial(block_neck_forward,
                                    in_channels=in_channels,
                                    out_channels=out_channels,
                                    stride=stride))
    y = fwd(x, params)
    jax.block_until_ready(y)

    expected_shape = (N, out_channels * EXPANSION, H // stride, W // stride)
    assert y.shape == expected_shape, (y.shape, expected_shape)
    assert bool(jnp.all(jnp.isfinite(y)))
    print("KERNEL_OK")
</pallas_src>

<mosaic_0001>
module attributes {stable_mosaic.version = 11 : i64} {
  func.func @_pw_dual_kernel(%arg0: i32, %arg1: memref<32x128xbf16, #tpu.memory_space<vmem>>, %arg2: memref<128x128xbf16, #tpu.memory_space<vmem>>, %arg3: memref<128x128xbf16, #tpu.memory_space<vmem>>, %arg4: memref<32x128xbf16, #tpu.memory_space<vmem>>, %arg5: memref<32x128xbf16, #tpu.memory_space<vmem>>, %arg6: memref<1x2x128xf32, #tpu.memory_space<vmem>>, %arg7: memref<1x2x128xf32, #tpu.memory_space<vmem>>) attributes {dimension_semantics = [#tpu.dimension_semantics<parallel>], iteration_bounds = array<i64: 4>, scalar_prefetch = 0 : i64, scratch_operands = 0 : i64, tpu.core_type = #tpu.core_type<tc>, window_params = [{transform_indices = @transform_0, window_bounds = array<i64: 32, 128>}, {pipeline_mode = #tpu.pipeline_mode<synchronous>, transform_indices = @transform_1, window_bounds = array<i64: 128, 128>}, {pipeline_mode = #tpu.pipeline_mode<synchronous>, transform_indices = @transform_2, window_bounds = array<i64: 128, 128>}, {transform_indices = @transform_3, window_bounds = array<i64: 32, 128>}, {transform_indices = @transform_4, window_bounds = array<i64: 32, 128>}, {transform_indices = @transform_5, window_bounds = array<i64: 1, 2, 128>}, {transform_indices = @transform_6, window_bounds = array<i64: 1, 2, 128>}]} {
    %c0 = arith.constant 0 : index
    %c0_0 = arith.constant 0 : index
    %0 = vector.load %arg1[%c0, %c0_0] : memref<32x128xbf16, #tpu.memory_space<vmem>>, vector<32x128xbf16>
    %c0_1 = arith.constant 0 : index
    %c0_2 = arith.constant 0 : index
    %1 = vector.load %arg2[%c0_1, %c0_2] : memref<128x128xbf16, #tpu.memory_space<vmem>>, vector<128x128xbf16>
    %cst = arith.constant dense<0.000000e+00> : vector<32x128xf32>
    %2 = tpu.matmul %0, %1, %cst {dimension_numbers = #tpu.dot_dimension_numbers<[1], [0], [0], [1], [0, 0, 1, 1], [], []>} : vector<32x128xbf16>, vector<128x128xbf16>, vector<32x128xf32> -> vector<32x128xf32>
    %c0_3 = arith.constant 0 : index
    %c0_4 = arith.constant 0 : index
    %3 = vector.load %arg3[%c0_3, %c0_4] : memref<128x128xbf16, #tpu.memory_space<vmem>>, vector<128x128xbf16>
    %cst_5 = arith.constant dense<0.000000e+00> : vector<32x128xf32>
    %4 = tpu.matmul %0, %3, %cst_5 {dimension_numbers = #tpu.dot_dimension_numbers<[1], [0], [0], [1], [0, 0, 1, 1], [], []>} : vector<32x128xbf16>, vector<128x128xbf16>, vector<32x128xf32> -> vector<32x128xf32>
    %5 = arith.truncf %2 : vector<32x128xf32> to vector<32x128xbf16>
    %6 = arith.truncf %4 : vector<32x128xf32> to vector<32x128xbf16>
    %c0_6 = arith.constant 0 : index
    %c0_7 = arith.constant 0 : index
    %7 = vector.load %arg4[%c0_6, %c0_7] : memref<32x128xbf16, #tpu.memory_space<vmem>>, vector<32x128xbf16>
    tpu.vector_store %arg4[%c0_6, %c0_7], %5 {strides = array<i32>} : memref<32x128xbf16, #tpu.memory_space<vmem>>, vector<32x128xbf16>,
    %c0_8 = arith.constant 0 : index
    %c0_9 = arith.constant 0 : index
    %8 = vector.load %arg5[%c0_8, %c0_9] : memref<32x128xbf16, #tpu.memory_space<vmem>>, vector<32x128xbf16>
    tpu.vector_store %arg5[%c0_8, %c0_9], %6 {strides = array<i32>} : memref<32x128xbf16, #tpu.memory_space<vmem>>, vector<32x128xbf16>,
    %9 = arith.extf %5 : vector<32x128xbf16> to vector<32x128xf32>
    %cst_10 = arith.constant dense<0.000000e+00> : vector<128xf32>
    %10 = vector.multi_reduction <add>, %9, %cst_10 [0] : vector<32x128xf32> to vector<128xf32>
    %11 = vector.shape_cast %10 : vector<128xf32> to vector<1x128xf32>
    %c0_11 = arith.constant 0 : index
    %c0_12 = arith.constant 0 : index
    %c0_13 = arith.constant 0 : index
    %12 = vector.load %arg6[%c0_11, %c0_12, %c0_13] : memref<1x2x128xf32, #tpu.memory_space<vmem>>, vector<1x1x128xf32>
    %13 = vector.shape_cast %12 : vector<1x1x128xf32> to vector<1x128xf32>
    %14 = vector.shape_cast %11 : vector<1x128xf32> to vector<1x1x128xf32>
    tpu.vector_store %arg6[%c0_11, %c0_12, %c0_13], %14 {strides = array<i32>} : memref<1x2x128xf32, #tpu.memory_space<vmem>>, vector<1x1x128xf32>,
    %15 = arith.mulf %9, %9 : vector<32x128xf32>
    %cst_14 = arith.constant dense<0.000000e+00> : vector<128xf32>
    %16 = vector.multi_reduction <add>, %15, %cst_14 [0] : vector<32x128xf32> to vector<128xf32>
    %17 = vector.shape_cast %16 : vector<128xf32> to vector<1x128xf32>
    %c0_15 = arith.constant 0 : index
    %c1 = arith.constant 1 : index
    %c0_16 = arith.constant 0 : index
    %18 = vector.load %arg6[%c0_15, %c1, %c0_16] : memref<1x2x128xf32, #tpu.memory_space<vmem>>, vector<1x1x128xf32>
    %19 = vector.shape_cast %18 : vector<1x1x128xf32> to vector<1x128xf32>
    %20 = vector.shape_cast %17 : vector<1x128xf32> to vector<1x1x128xf32>
    tpu.vector_store %arg6[%c0_15, %c1, %c0_16], %20 {strides = array<i32>} : memref<1x2x128xf32, #tpu.memory_space<vmem>>, vector<1x1x128xf32>,
    %21 = arith.extf %6 : vector<32x128xbf16> to vector<32x128xf32>
    %cst_17 = arith.constant dense<0.000000e+00> : vector<128xf32>
    %22 = vector.multi_reduction <add>, %21, %cst_17 [0] : vector<32x128xf32> to vector<128xf32>
    %23 = vector.shape_cast %22 : vector<128xf32> to vector<1x128xf32>
    %c0_18 = arith.constant 0 : index
    %c0_19 = arith.constant 0 : index
    %c0_20 = arith.constant 0 : index
    %24 = vector.load %arg7[%c0_18, %c0_19, %c0_20] : memref<1x2x128xf32, #tpu.memory_space<vmem>>, vector<1x1x128xf32>
    %25 = vector.shape_cast %24 : vector<1x1x128xf32> to vector<1x128xf32>
    %26 = vector.shape_cast %23 : vector<1x128xf32> to vector<1x1x128xf32>
    tpu.vector_store %arg7[%c0_18, %c0_19, %c0_20], %26 {strides = array<i32>} : memref<1x2x128xf32, #tpu.memory_space<vmem>>, vector<1x1x128xf32>,
    %27 = arith.mulf %21, %21 : vector<32x128xf32>
    %cst_21 = arith.constant dense<0.000000e+00> : vector<128xf32>
    %28 = vector.multi_reduction <add>, %27, %cst_21 [0] : vector<32x128xf32> to vector<128xf32>
    %29 = vector.shape_cast %28 : vector<128xf32> to vector<1x128xf32>
    %c0_22 = arith.constant 0 : index
    %c1_23 = arith.constant 1 : index
    %c0_24 = arith.constant 0 : index
    %30 = vector.load %arg7[%c0_22, %c1_23, %c0_24] : memref<1x2x128xf32, #tpu.memory_space<vmem>>, vector<1x1x128xf32>
    %31 = vector.shape_cast %30 : vector<1x1x128xf32> to vector<1x128xf32>
    %32 = vector.shape_cast %29 : vector<1x128xf32> to vector<1x1x128xf32>
    tpu.vector_store %arg7[%c0_22, %c1_23, %c0_24], %32 {strides = array<i32>} : memref<1x2x128xf32, #tpu.memory_space<vmem>>, vector<1x1x128xf32>,
    return
  }
  func.func @transform_0(%arg0: i32) -> (i32, i32) {
    %c0_i32 = arith.constant 0 : i32
    %c0_i32_0 = arith.constant 0 : i32
    return %arg0, %c0_i32 : i32, i32
  }
  func.func @transform_1(%arg0: i32) -> (i32, i32) {
    %c0_i32 = arith.constant 0 : i32
    %c0_i32_0 = arith.constant 0 : i32
    %c0_i32_1 = arith.constant 0 : i32
    return %c0_i32, %c0_i32_0 : i32, i32
  }
  func.func @transform_2(%arg0: i32) -> (i32, i32) {
    %c0_i32 = arith.constant 0 : i32
    %c0_i32_0 = arith.constant 0 : i32
    %c0_i32_1 = arith.constant 0 : i32
    return %c0_i32, %c0_i32_0 : i32, i32
  }
  func.func @transform_3(%arg0: i32) -> (i32, i32) {
    %c0_i32 = arith.constant 0 : i32
    %c0_i32_0 = arith.constant 0 : i32
    return %arg0, %c0_i32 : i32, i32
  }
  func.func @transform_4(%arg0: i32) -> (i32, i32) {
    %c0_i32 = arith.constant 0 : i32
    %c0_i32_0 = arith.constant 0 : i32
    return %arg0, %c0_i32 : i32, i32
  }
  func.func @transform_5(%arg0: i32) -> (i32, i32, i32) {
    %c0_i32 = arith.constant 0 : i32
    %c0_i32_0 = arith.constant 0 : i32
    %c0_i32_1 = arith.constant 0 : i32
    return %arg0, %c0_i32, %c0_i32_0 : i32, i32, i32
  }
  func.func @transform_6(%arg0: i32) -> (i32, i32, i32) {
    %c0_i32 = arith.constant 0 : i32
    %c0_i32_0 = arith.constant 0 : i32
    %c0_i32_1 = arith.constant 0 : i32
    return %arg0, %c0_i32, %c0_i32_0 : i32, i32, i32
  }
}

module attributes {stable_mosaic.version = 11 : i64} {
  func.func @_conv3x3_kernel(%arg0: i32, %arg1: memref<1x8x8x128xbf16, #tpu.memory_space<vmem>>, %arg2: memref<1x1x128xf32, #tpu.memory_space<vmem>>, %arg3: memref<1x1x128xf32, #tpu.memory_space<vmem>>, %arg4: memref<9x128x128xbf16, #tpu.memory_space<vmem>>, %arg5: memref<1x8x8x128xbf16, #tpu.memory_space<vmem>>, %arg6: memref<1x2x128xf32, #tpu.memory_space<vmem>>, %arg7: memref<10x10x128xf32, #tpu.memory_space<vmem>>) attributes {dimension_semantics = [#tpu.dimension_semantics<parallel>], iteration_bounds = array<i64: 2>, scalar_prefetch = 0 : i64, scratch_operands = 1 : i64, tpu.core_type = #tpu.core_type<tc>, window_params = [{transform_indices = @transform_0, window_bounds = array<i64: 1, 8, 8, 128>}, {pipeline_mode = #tpu.pipeline_mode<synchronous>, transform_indices = @transform_1, window_bounds = array<i64: 1, 1, 128>}, {pipeline_mode = #tpu.pipeline_mode<synchronous>, transform_indices = @transform_2, window_bounds = array<i64: 1, 1, 128>}, {pipeline_mode = #tpu.pipeline_mode<synchronous>, transform_indices = @transform_3, window_bounds = array<i64: 9, 128, 128>}, {transform_indices = @transform_4, window_bounds = array<i64: 1, 8, 8, 128>}, {transform_indices = @transform_5, window_bounds = array<i64: 1, 2, 128>}]} {
    %c0 = arith.constant 0 : index
    %c0_0 = arith.constant 0 : index
    %c0_1 = arith.constant 0 : index
    %c0_2 = arith.constant 0 : index
    %0 = vector.load %arg1[%c0, %c0_0, %c0_1, %c0_2] : memref<1x8x8x128xbf16, #tpu.memory_space<vmem>>, vector<1x8x8x128xbf16>
    %1 = vector.shape_cast %0 : vector<1x8x8x128xbf16> to vector<8x8x128xbf16>
    %2 = arith.extf %1 : vector<8x8x128xbf16> to vector<8x8x128xf32>
    %c0_3 = arith.constant 0 : index
    %c0_4 = arith.constant 0 : index
    %c0_5 = arith.constant 0 : index
    %3 = vector.load %arg2[%c0_3, %c0_4, %c0_5] : memref<1x1x128xf32, #tpu.memory_space<vmem>>, vector<1x1x128xf32>
    %4 = vector.broadcast %3 : vector<1x1x128xf32> to vector<8x8x128xf32>
    %5 = arith.mulf %2, %4 : vector<8x8x128xf32>
    %c0_6 = arith.constant 0 : index
    %c0_7 = arith.constant 0 : index
    %c0_8 = arith.constant 0 : index
    %6 = vector.load %arg3[%c0_6, %c0_7, %c0_8] : memref<1x1x128xf32, #tpu.memory_space<vmem>>, vector<1x1x128xf32>
    %7 = vector.broadcast %6 : vector<1x1x128xf32> to vector<8x8x128xf32>
    %8 = arith.addf %5, %7 : vector<8x8x128xf32>
    %cst = arith.constant 0.000000e+00 : f32
    %9 = vector.broadcast %cst : f32 to vector<8x8x128xf32>
    %10 = arith.maximumf %8, %9 : vector<8x8x128xf32>
    %cst_9 = arith.constant 0.000000e+00 : f32
    %11 = vector.broadcast %cst_9 : f32 to vector<8x1x128xf32>
    %cst_10 = arith.constant 0.000000e+00 : f32
    %12 = vector.broadcast %cst_10 : f32 to vector<1x10x128xf32>
    %13 = tpu.concatenate %11, %10, %11 in 1 : vector<8x1x128xf32>, vector<8x8x128xf32>, vector<8x1x128xf32> -> vector<8x10x128xf32>
    %14 = tpu.concatenate %12, %13, %12 in 0 : vector<1x10x128xf32>, vector<8x10x128xf32>, vector<1x10x128xf32> -> vector<10x10x128xf32>
    %c0_11 = arith.constant 0 : index
    %c0_12 = arith.constant 0 : index
    %c0_13 = arith.constant 0 : index
    %15 = vector.load %arg7[%c0_11, %c0_12, %c0_13] : memref<10x10x128xf32, #tpu.memory_space<vmem>>, vector<10x10x128xf32>
    tpu.vector_store %arg7[%c0_11, %c0_12, %c0_13], %14 {strides = array<i32>} : memref<10x10x128xf32, #tpu.memory_space<vmem>>, vector<10x10x128xf32>,
    %cst_14 = arith.constant 0.000000e+00 : f32
    %16 = vector.broadcast %cst_14 : f32 to vector<64x128xf32>
    %c0_15 = arith.constant 0 : index
    %c0_16 = arith.constant 0 : index
    %c0_17 = arith.constant 0 : index
    %17 = vector.load %arg7[%c0_15, %c0_16, %c0_17] : memref<10x10x128xf32, #tpu.memory_space<vmem>>, vector<8x8x128xf32>
    %18 = vector.shape_cast %17 : vector<8x8x128xf32> to vector<64x128xf32>
    %19 = arith.truncf %18 : vector<64x128xf32> to vector<64x128xbf16>
    %c0_18 = arith.constant 0 : index
    %c0_19 = arith.constant 0 : index
    %c0_20 = arith.constant 0 : index
    %20 = vector.load %arg4[%c0_18, %c0_19, %c0_20] : memref<9x128x128xbf16, #tpu.memory_space<vmem>>, vector<1x128x128xbf16>
    %21 = vector.shape_cast %20 : vector<1x128x128xbf16> to vector<128x128xbf16>
    %cst_21 = arith.constant dense<0.000000e+00> : vector<64x128xf32>
    %22 = tpu.matmul %19, %21, %cst_21 {dimension_numbers = #tpu.dot_dimension_numbers<[1], [0], [0], [1], [0, 0, 1, 1], [], []>} : vector<64x128xbf16>, vector<128x128xbf16>, vector<64x128xf32> -> vector<64x128xf32>
    %23 = arith.addf %16, %22 : vector<64x128xf32>
    %c0_22 = arith.constant 0 : index
    %c1 = arith.constant 1 : index
    %c0_23 = arith.constant 0 : index
    %24 = vector.load %arg7[%c0_22, %c1, %c0_23] : memref<10x10x128xf32, #tpu.memory_space<vmem>>, vector<8x8x128xf32>
    %25 = vector.shape_cast %24 : vector<8x8x128xf32> to vector<64x128xf32>
    %26 = arith.truncf %25 : vector<64x128xf32> to vector<64x128xbf16>
    %c1_24 = arith.constant 1 : index
    %c0_25 = arith.constant 0 : index
    %c0_26 = arith.constant 0 : index
    %27 = vector.load %arg4[%c1_24, %c0_25, %c0_26] : memref<9x128x128xbf16, #tpu.memory_space<vmem>>, vector<1x128x128xbf16>
    %28 = vector.shape_cast %27 : vector<1x128x128xbf16> to vector<128x128xbf16>
    %cst_27 = arith.constant dense<0.000000e+00> : vector<64x128xf32>
    %29 = tpu.matmul %26, %28, %cst_27 {dimension_numbers = #tpu.dot_dimension_numbers<[1], [0], [0], [1], [0, 0, 1, 1], [], []>} : vector<64x128xbf16>, vector<128x128xbf16>, vector<64x128xf32> -> vector<64x128xf32>
    %30 = arith.addf %23, %29 : vector<64x128xf32>
    %c0_28 = arith.constant 0 : index
    %c2 = arith.constant 2 : index
    %c0_29 = arith.constant 0 : index
    %31 = vector.load %arg7[%c0_28, %c2, %c0_29] : memref<10x10x128xf32, #tpu.memory_space<vmem>>, vector<8x8x128xf32>
    %32 = vector.shape_cast %31 : vector<8x8x128xf32> to vector<64x128xf32>
    %33 = arith.truncf %32 : vector<64x128xf32> to vector<64x128xbf16>
    %c2_30 = arith.constant 2 : index
    %c0_31 = arith.constant 0 : index
    %c0_32 = arith.constant 0 : index
    %34 = vector.load %arg4[%c2_30, %c0_31, %c0_32] : memref<9x128x128xbf16, #tpu.memory_space<vmem>>, vector<1x128x128xbf16>
    %35 = vector.shape_cast %34 : vector<1x128x128xbf16> to vector<128x128xbf16>
    %cst_33 = arith.constant dense<0.000000e+00> : vector<64x128xf32>
    %36 = tpu.matmul %33, %35, %cst_33 {dimension_numbers = #tpu.dot_dimension_numbers<[1], [0], [0], [1], [0, 0, 1, 1], [], []>} : vector<64x128xbf16>, vector<128x128xbf16>, vector<64x128xf32> -> vector<64x128xf32>
    %37 = arith.addf %30, %36 : vector<64x128xf32>
    %c1_34 = arith.constant 1 : index
    %c0_35 = arith.constant 0 : index
    %c0_36 = arith.constant 0 : index
    %38 = vector.load %arg7[%c1_34, %c0_35, %c0_36] : memref<10x10x128xf32, #tpu.memory_space<vmem>>, vector<8x8x128xf32>
    %39 = vector.shape_cast %38 : vector<8x8x128xf32> to vector<64x128xf32>
    %40 = arith.truncf %39 : vector<64x128xf32> to vector<64x128xbf16>
    %c3 = arith.constant 3 : index
    %c0_37 = arith.constant 0 : index
    %c0_38 = arith.constant 0 : index
    %41 = vector.load %arg4[%c3, %c0_37, %c0_38] : memref<9x128x128xbf16, #tpu.memory_space<vmem>>, vector<1x128x128xbf16>
    %42 = vector.shape_cast %41 : vector<1x128x128xbf16> to vector<128x128xbf16>
    %cst_39 = arith.constant dense<0.000000e+00> : vector<64x128xf32>
    %43 = tpu.matmul %40, %42, %cst_39 {dimension_numbers = #tpu.dot_dimension_numbers<[1], [0], [0], [1], [0, 0, 1, 1], [], []>} : vector<64x128xbf16>, vector<128x128xbf16>, vector<64x128xf32> -> vector<64x128xf32>
    %44 = arith.addf %37, %43 : vector<64x128xf32>
    %c1_40 = arith.constant 1 : index
    %c1_41 = arith.constant 1 : index
    %c0_42 = arith.constant 0 : index
    %45 = vector.load %arg7[%c1_40, %c1_41, %c0_42] : memref<10x10x128xf32, #tpu.memory_space<vmem>>, vector<8x8x128xf32>
    %46 = vector.shape_cast %45 : vector<8x8x128xf32> to vector<64x128xf32>
    %47 = arith.truncf %46 : vector<64x128xf32> to vector<64x128xbf16>
    %c4 = arith.constant 4 : index
    %c0_43 = arith.constant 0 : index
    %c0_44 = arith.constant 0 : index
    %48 = vector.load %arg4[%c4, %c0_43, %c0_44] : memref<9x128x128xbf16, #tpu.memory_space<vmem>>, vector<1x128x128xbf16>
    %49 = vector.shape_cast %48 : vector<1x128x128xbf16> to vector<128x128xbf16>
    %cst_45 = arith.constant dense<0.000000e+00> : vector<64x128xf32>
    %50 = tpu.matmul %47, %49, %cst_45 {dimension_numbers = #tpu.dot_dimension_numbers<[1], [0], [0], [1], [0, 0, 1, 1], [], []>} : vector<64x128xbf16>, vector<128x128xbf16>, vector<64x128xf32> -> vector<64x128xf32>
    %51 = arith.addf %44, %50 : vector<64x128xf32>
    %c1_46 = arith.constant 1 : index
    %c2_47 = arith.constant 2 : index
    %c0_48 = arith.constant 0 : index
    %52 = vector.load %arg7[%c1_46, %c2_47, %c0_48] : memref<10x10x128xf32, #tpu.memory_space<vmem>>, vector<8x8x128xf32>
    %53 = vector.shape_cast %52 : vector<8x8x128xf32> to vector<64x128xf32>
    %54 = arith.truncf %53 : vector<64x128xf32> to vector<64x128xbf16>
    %c5 = arith.constant 5 : index
    %c0_49 = arith.constant 0 : index
    %c0_50 = arith.constant 0 : index
    %55 = vector.load %arg4[%c5, %c0_49, %c0_50] : memref<9x128x128xbf16, #tpu.memory_space<vmem>>, vector<1x128x128xbf16>
    %56 = vector.shape_cast %55 : vector<1x128x128xbf16> to vector<128x128xbf16>
    %cst_51 = arith.constant dense<0.000000e+00> : vector<64x128xf32>
    %57 = tpu.matmul %54, %56, %cst_51 {dimension_numbers = #tpu.dot_dimension_numbers<[1], [0], [0], [1], [0, 0, 1, 1], [], []>} : vector<64x128xbf16>, vector<128x128xbf16>, vector<64x128xf32> -> vector<64x128xf32>
    %58 = arith.addf %51, %57 : vector<64x128xf32>
    %c2_52 = arith.constant 2 : index
    %c0_53 = arith.constant 0 : index
    %c0_54 = arith.constant 0 : index
    %59 = vector.load %arg7[%c2_52, %c0_53, %c0_54] : memref<10x10x128xf32, #tpu.memory_space<vmem>>, vector<8x8x128xf32>
    %60 = vector.shape_cast %59 : vector<8x8x128xf32> to vector<64x128xf32>
    %61 = arith.truncf %60 : vector<64x128xf32> to vector<64x128xbf16>
    %c6 = arith.constant 6 : index
    %c0_55 = arith.constant 0 : index
    %c0_56 = arith.constant 0 : index
    %62 = vector.load %arg4[%c6, %c0_55, %c0_56] : memref<9x128x128xbf16, #tpu.memory_space<vmem>>, vector<1x128x128xbf16>
    %63 = vector.shape_cast %62 : vector<1x128x128xbf16> to vector<128x128xbf16>
    %cst_57 = arith.constant dense<0.000000e+00> : vector<64x128xf32>
    %64 = tpu.matmul %61, %63, %cst_57 {dimension_numbers = #tpu.dot_dimension_numbers<[1], [0], [0], [1], [0, 0, 1, 1], [], []>} : vector<64x128xbf16>, vector<128x128xbf16>, vector<64x128xf32> -> vector<64x128xf32>
    %65 = arith.addf %58, %64 : vector<64x128xf32>
    %c2_58 = arith.constant 2 : index
    %c1_59 = arith.constant 1 : index
    %c0_60 = arith.constant 0 : index
    %66 = vector.load %arg7[%c2_58, %c1_59, %c0_60] : memref<10x10x128xf32, #tpu.memory_space<vmem>>, vector<8x8x128xf32>
    %67 = vector.shape_cast %66 : vector<8x8x128xf32> to vector<64x128xf32>
    %68 = arith.truncf %67 : vector<64x128xf32> to vector<64x128xbf16>
    %c7 = arith.constant 7 : index
    %c0_61 = arith.constant 0 : index
    %c0_62 = arith.constant 0 : index
    %69 = vector.load %arg4[%c7, %c0_61, %c0_62] : memref<9x128x128xbf16, #tpu.memory_space<vmem>>, vector<1x128x128xbf16>
    %70 = vector.shape_cast %69 : vector<1x128x128xbf16> to vector<128x128xbf16>
    %cst_63 = arith.constant dense<0.000000e+00> : vector<64x128xf32>
    %71 = tpu.matmul %68, %70, %cst_63 {dimension_numbers = #tpu.dot_dimension_numbers<[1], [0], [0], [1], [0, 0, 1, 1], [], []>} : vector<64x128xbf16>, vector<128x128xbf16>, vector<64x128xf32> -> vector<64x128xf32>
    %72 = arith.addf %65, %71 : vector<64x128xf32>
    %c2_64 = arith.constant 2 : index
    %c2_65 = arith.constant 2 : index
    %c0_66 = arith.constant 0 : index
    %73 = vector.load %arg7[%c2_64, %c2_65, %c0_66] : memref<10x10x128xf32, #tpu.memory_space<vmem>>, vector<8x8x128xf32>
    %74 = vector.shape_cast %73 : vector<8x8x128xf32> to vector<64x128xf32>
    %75 = arith.truncf %74 : vector<64x128xf32> to vector<64x128xbf16>
    %c8 = arith.constant 8 : index
    %c0_67 = arith.constant 0 : index
    %c0_68 = arith.constant 0 : index
    %76 = vector.load %arg4[%c8, %c0_67, %c0_68] : memref<9x128x128xbf16, #tpu.memory_space<vmem>>, vector<1x128x128xbf16>
    %77 = vector.shape_cast %76 : vector<1x128x128xbf16> to vector<128x128xbf16>
    %cst_69 = arith.constant dense<0.000000e+00> : vector<64x128xf32>
    %78 = tpu.matmul %75, %77, %cst_69 {dimension_numbers = #tpu.dot_dimension_numbers<[1], [0], [0], [1], [0, 0, 1, 1], [], []>} : vector<64x128xbf16>, vector<128x128xbf16>, vector<64x128xf32> -> vector<64x128xf32>
    %79 = arith.addf %72, %78 : vector<64x128xf32>
    %80 = arith.truncf %79 : vector<64x128xf32> to vector<64x128xbf16>
    %81 = arith.extf %80 : vector<64x128xbf16> to vector<64x128xf32>
    %82 = vector.shape_cast %81 : vector<64x128xf32> to vector<1x8x8x128xf32>
    %83 = arith.truncf %82 : vector<1x8x8x128xf32> to vector<1x8x8x128xbf16>
    %c0_70 = arith.constant 0 : index
    %c0_71 = arith.constant 0 : index
    %c0_72 = arith.constant 0 : index
    %c0_73 = arith.constant 0 : index
    %84 = vector.load %arg5[%c0_70, %c0_71, %c0_72, %c0_73] : memref<1x8x8x128xbf16, #tpu.memory_space<vmem>>, vector<1x8x8x128xbf16>
    tpu.vector_store %arg5[%c0_70, %c0_71, %c0_72, %c0_73], %83 {strides = array<i32>} : memref<1x8x8x128xbf16, #tpu.memory_space<vmem>>, vector<1x8x8x128xbf16>,
    %cst_74 = arith.constant dense<0.000000e+00> : vector<128xf32>
    %85 = vector.multi_reduction <add>, %81, %cst_74 [0] : vector<64x128xf32> to vector<128xf32>
    %86 = vector.shape_cast %85 : vector<128xf32> to vector<1x128xf32>
    %c0_75 = arith.constant 0 : index
    %c0_76 = arith.constant 0 : index
    %c0_77 = arith.constant 0 : index
    %87 = vector.load %arg6[%c0_75, %c0_76, %c0_77] : memref<1x2x128xf32, #tpu.memory_space<vmem>>, vector<1x1x128xf32>
    %88 = vector.shape_cast %87 : vector<1x1x128xf32> to vector<1x128xf32>
    %89 = vector.shape_cast %86 : vector<1x128xf32> to vector<1x1x128xf32>
    tpu.vector_store %arg6[%c0_75, %c0_76, %c0_77], %89 {strides = array<i32>} : memref<1x2x128xf32, #tpu.memory_space<vmem>>, vector<1x1x128xf32>,
    %90 = arith.mulf %81, %81 : vector<64x128xf32>
    %cst_78 = arith.constant dense<0.000000e+00> : vector<128xf32>
    %91 = vector.multi_reduction <add>, %90, %cst_78 [0] : vector<64x128xf32> to vector<128xf32>
    %92 = vector.shape_cast %91 : vector<128xf32> to vector<1x128xf32>
    %c0_79 = arith.constant 0 : index
    %c1_80 = arith.constant 1 : index
    %c0_81 = arith.constant 0 : index
    %93 = vector.load %arg6[%c0_79, %c1_80, %c0_81] : memref<1x2x128xf32, #tpu.memory_space<vmem>>, vector<1x1x128xf32>
    %94 = vector.shape_cast %93 : vector<1x1x128xf32> to vector<1x128xf32>
    %95 = vector.shape_cast %92 : vector<1x128xf32> to vector<1x1x128xf32>
    tpu.vector_store %arg6[%c0_79, %c1_80, %c0_81], %95 {strides = array<i32>} : memref<1x2x128xf32, #tpu.memory_space<vmem>>, vector<1x1x128xf32>,
    return
  }
  func.func @transform_0(%arg0: i32) -> (i32, i32, i32, i32) {
    %c0_i32 = arith.constant 0 : i32
    %c0_i32_0 = arith.constant 0 : i32
    %c0_i32_1 = arith.constant 0 : i32
    %c0_i32_2 = arith.constant 0 : i32
    return %arg0, %c0_i32, %c0_i32_0, %c0_i32_1 : i32, i32, i32, i32
  }
  func.func @transform_1(%arg0: i32) -> (i32, i32, i32) {
    %c0_i32 = arith.constant 0 : i32
    %c0_i32_0 = arith.constant 0 : i32
    %c0_i32_1 = arith.constant 0 : i32
    %c0_i32_2 = arith.constant 0 : i32
    return %c0_i32, %c0_i32_0, %c0_i32_1 : i32, i32, i32
  }
  func.func @transform_2(%arg0: i32) -> (i32, i32, i32) {
    %c0_i32 = arith.constant 0 : i32
    %c0_i32_0 = arith.constant 0 : i32
    %c0_i32_1 = arith.constant 0 : i32
    %c0_i32_2 = arith.constant 0 : i32
    return %c0_i32, %c0_i32_0, %c0_i32_1 : i32, i32, i32
  }
  func.func @transform_3(%arg0: i32) -> (i32, i32, i32) {
    %c0_i32 = arith.constant 0 : i32
    %c0_i32_0 = arith.constant 0 : i32
    %c0_i32_1 = arith.constant 0 : i32
    %c0_i32_2 = arith.constant 0 : i32
    return %c0_i32, %c0_i32_0, %c0_i32_1 : i32, i32, i32
  }
  func.func @transform_4(%arg0: i32) -> (i32, i32, i32, i32) {
    %c0_i32 = arith.constant 0 : i32
    %c0_i32_0 = arith.constant 0 : i32
    %c0_i32_1 = arith.constant 0 : i32
    %c0_i32_2 = arith.constant 0 : i32
    return %arg0, %c0_i32, %c0_i32_0, %c0_i32_1 : i32, i32, i32, i32
  }
  func.func @transform_5(%arg0: i32) -> (i32, i32, i32) {
    %c0_i32 = arith.constant 0 : i32
    %c0_i32_0 = arith.constant 0 : i32
    %c0_i32_1 = arith.constant 0 : i32
    return %arg0, %c0_i32, %c0_i32_0 : i32, i32, i32
  }
}

module attributes {stable_mosaic.version = 11 : i64} {
  func.func @_epilogue_kernel(%arg0: i32, %arg1: memref<32x128xbf16, #tpu.memory_space<vmem>>, %arg2: memref<32x128xbf16, #tpu.memory_space<vmem>>, %arg3: memref<1x128xf32, #tpu.memory_space<vmem>>, %arg4: memref<1x128xf32, #tpu.memory_space<vmem>>, %arg5: memref<1x128xf32, #tpu.memory_space<vmem>>, %arg6: memref<1x128xf32, #tpu.memory_space<vmem>>, %arg7: memref<32x128xf32, #tpu.memory_space<vmem>>) attributes {dimension_semantics = [#tpu.dimension_semantics<parallel>], iteration_bounds = array<i64: 4>, scalar_prefetch = 0 : i64, scratch_operands = 0 : i64, tpu.core_type = #tpu.core_type<tc>, window_params = [{transform_indices = @transform_0, window_bounds = array<i64: 32, 128>}, {transform_indices = @transform_1, window_bounds = array<i64: 32, 128>}, {pipeline_mode = #tpu.pipeline_mode<synchronous>, transform_indices = @transform_2, window_bounds = array<i64: 1, 128>}, {pipeline_mode = #tpu.pipeline_mode<synchronous>, transform_indices = @transform_3, window_bounds = array<i64: 1, 128>}, {pipeline_mode = #tpu.pipeline_mode<synchronous>, transform_indices = @transform_4, window_bounds = array<i64: 1, 128>}, {pipeline_mode = #tpu.pipeline_mode<synchronous>, transform_indices = @transform_5, window_bounds = array<i64: 1, 128>}, {transform_indices = @transform_6, window_bounds = array<i64: 32, 128>}]} {
    %c0 = arith.constant 0 : index
    %c0_0 = arith.constant 0 : index
    %0 = vector.load %arg1[%c0, %c0_0] : memref<32x128xbf16, #tpu.memory_space<vmem>>, vector<32x128xbf16>
    %1 = arith.extf %0 : vector<32x128xbf16> to vector<32x128xf32>
    %c0_1 = arith.constant 0 : index
    %c0_2 = arith.constant 0 : index
    %2 = vector.load %arg3[%c0_1, %c0_2] : memref<1x128xf32, #tpu.memory_space<vmem>>, vector<1x128xf32>
    %3 = vector.broadcast %2 : vector<1x128xf32> to vector<32x128xf32>
    %4 = arith.mulf %1, %3 : vector<32x128xf32>
    %c0_3 = arith.constant 0 : index
    %c0_4 = arith.constant 0 : index
    %5 = vector.load %arg4[%c0_3, %c0_4] : memref<1x128xf32, #tpu.memory_space<vmem>>, vector<1x128xf32>
    %6 = vector.broadcast %5 : vector<1x128xf32> to vector<32x128xf32>
    %7 = arith.addf %4, %6 : vector<32x128xf32>
    %c0_5 = arith.constant 0 : index
    %c0_6 = arith.constant 0 : index
    %8 = vector.load %arg2[%c0_5, %c0_6] : memref<32x128xbf16, #tpu.memory_space<vmem>>, vector<32x128xbf16>
    %9 = arith.extf %8 : vector<32x128xbf16> to vector<32x128xf32>
    %c0_7 = arith.constant 0 : index
    %c0_8 = arith.constant 0 : index
    %10 = vector.load %arg5[%c0_7, %c0_8] : memref<1x128xf32, #tpu.memory_space<vmem>>, vector<1x128xf32>
    %11 = vector.broadcast %10 : vector<1x128xf32> to vector<32x128xf32>
    %12 = arith.mulf %9, %11 : vector<32x128xf32>
    %c0_9 = arith.constant 0 : index
    %c0_10 = arith.constant 0 : index
    %13 = vector.load %arg6[%c0_9, %c0_10] : memref<1x128xf32, #tpu.memory_space<vmem>>, vector<1x128xf32>
    %14 = vector.broadcast %13 : vector<1x128xf32> to vector<32x128xf32>
    %15 = arith.addf %12, %14 : vector<32x128xf32>
    %16 = arith.addf %7, %15 : vector<32x128xf32>
    %cst = arith.constant 0.000000e+00 : f32
    %17 = vector.broadcast %cst : f32 to vector<32x128xf32>
    %18 = arith.maximumf %16, %17 : vector<32x128xf32>
    %c0_11 = arith.constant 0 : index
    %c0_12 = arith.constant 0 : index
    %19 = vector.load %arg7[%c0_11, %c0_12] : memref<32x128xf32, #tpu.memory_space<vmem>>, vector<32x128xf32>
    tpu.vector_store %arg7[%c0_11, %c0_12], %18 {strides = array<i32>} : memref<32x128xf32, #tpu.memory_space<vmem>>, vector<32x128xf32>,
    return
  }
  func.func @transform_0(%arg0: i32) -> (i32, i32) {
    %c0_i32 = arith.constant 0 : i32
    %c0_i32_0 = arith.constant 0 : i32
    return %arg0, %c0_i32 : i32, i32
  }
  func.func @transform_1(%arg0: i32) -> (i32, i32) {
    %c0_i32 = arith.constant 0 : i32
    %c0_i32_0 = arith.constant 0 : i32
    return %arg0, %c0_i32 : i32, i32
  }
  func.func @transform_2(%arg0: i32) -> (i32, i32) {
    %c0_i32 = arith.constant 0 : i32
    %c0_i32_0 = arith.constant 0 : i32
    %c0_i32_1 = arith.constant 0 : i32
    return %c0_i32, %c0_i32_0 : i32, i32
  }
  func.func @transform_3(%arg0: i32) -> (i32, i32) {
    %c0_i32 = arith.constant 0 : i32
    %c0_i32_0 = arith.constant 0 : i32
    %c0_i32_1 = arith.constant 0 : i32
    return %c0_i32, %c0_i32_0 : i32, i32
  }
  func.func @transform_4(%arg0: i32) -> (i32, i32) {
    %c0_i32 = arith.constant 0 : i32
    %c0_i32_0 = arith.constant 0 : i32
    %c0_i32_1 = arith.constant 0 : i32
    return %c0_i32, %c0_i32_0 : i32, i32
  }
  func.func @transform_5(%arg0: i32) -> (i32, i32) {
    %c0_i32 = arith.constant 0 : i32
    %c0_i32_0 = arith.constant 0 : i32
    %c0_i32_1 = arith.constant 0 : i32
    return %c0_i32, %c0_i32_0 : i32, i32
  }
  func.func @transform_6(%arg0: i32) -> (i32, i32) {
    %c0_i32 = arith.constant 0 : i32
    %c0_i32_0 = arith.constant 0 : i32
    return %arg0, %c0_i32 : i32, i32
  }
}

module attributes {stable_mosaic.version = 11 : i64} {
  func.func @_pw_norm_kernel(%arg0: i32, %arg1: memref<32x128xbf16, #tpu.memory_space<vmem>>, %arg2: memref<1x128xf32, #tpu.memory_space<vmem>>, %arg3: memref<1x128xf32, #tpu.memory_space<vmem>>, %arg4: memref<128x128xbf16, #tpu.memory_space<vmem>>, %arg5: memref<32x128xbf16, #tpu.memory_space<vmem>>, %arg6: memref<1x2x128xf32, #tpu.memory_space<vmem>>) attributes {dimension_semantics = [#tpu.dimension_semantics<parallel>], iteration_bounds = array<i64: 4>, scalar_prefetch = 0 : i64, scratch_operands = 0 : i64, tpu.core_type = #tpu.core_type<tc>, window_params = [{transform_indices = @transform_0, window_bounds = array<i64: 32, 128>}, {pipeline_mode = #tpu.pipeline_mode<synchronous>, transform_indices = @transform_1, window_bounds = array<i64: 1, 128>}, {pipeline_mode = #tpu.pipeline_mode<synchronous>, transform_indices = @transform_2, window_bounds = array<i64: 1, 128>}, {pipeline_mode = #tpu.pipeline_mode<synchronous>, transform_indices = @transform_3, window_bounds = array<i64: 128, 128>}, {transform_indices = @transform_4, window_bounds = array<i64: 32, 128>}, {transform_indices = @transform_5, window_bounds = array<i64: 1, 2, 128>}]} {
    %c0 = arith.constant 0 : index
    %c0_0 = arith.constant 0 : index
    %0 = vector.load %arg1[%c0, %c0_0] : memref<32x128xbf16, #tpu.memory_space<vmem>>, vector<32x128xbf16>
    %1 = arith.extf %0 : vector<32x128xbf16> to vector<32x128xf32>
    %c0_1 = arith.constant 0 : index
    %c0_2 = arith.constant 0 : index
    %2 = vector.load %arg2[%c0_1, %c0_2] : memref<1x128xf32, #tpu.memory_space<vmem>>, vector<1x128xf32>
    %3 = vector.broadcast %2 : vector<1x128xf32> to vector<32x128xf32>
    %4 = arith.mulf %1, %3 : vector<32x128xf32>
    %c0_3 = arith.constant 0 : index
    %c0_4 = arith.constant 0 : index
    %5 = vector.load %arg3[%c0_3, %c0_4] : memref<1x128xf32, #tpu.memory_space<vmem>>, vector<1x128xf32>
    %6 = vector.broadcast %5 : vector<1x128xf32> to vector<32x128xf32>
    %7 = arith.addf %4, %6 : vector<32x128xf32>
    %cst = arith.constant 0.000000e+00 : f32
    %8 = vector.broadcast %cst : f32 to vector<32x128xf32>
    %9 = arith.maximumf %7, %8 : vector<32x128xf32>
    %10 = arith.truncf %9 : vector<32x128xf32> to vector<32x128xbf16>
    %c0_5 = arith.constant 0 : index
    %c0_6 = arith.constant 0 : index
    %11 = vector.load %arg4[%c0_5, %c0_6] : memref<128x128xbf16, #tpu.memory_space<vmem>>, vector<128x128xbf16>
    %cst_7 = arith.constant dense<0.000000e+00> : vector<32x128xf32>
    %12 = tpu.matmul %10, %11, %cst_7 {dimension_numbers = #tpu.dot_dimension_numbers<[1], [0], [0], [1], [0, 0, 1, 1], [], []>} : vector<32x128xbf16>, vector<128x128xbf16>, vector<32x128xf32> -> vector<32x128xf32>
    %13 = arith.truncf %12 : vector<32x128xf32> to vector<32x128xbf16>
    %c0_8 = arith.constant 0 : index
    %c0_9 = arith.constant 0 : index
    %14 = vector.load %arg5[%c0_8, %c0_9] : memref<32x128xbf16, #tpu.memory_space<vmem>>, vector<32x128xbf16>
    tpu.vector_store %arg5[%c0_8, %c0_9], %13 {strides = array<i32>} : memref<32x128xbf16, #tpu.memory_space<vmem>>, vector<32x128xbf16>,
    %15 = arith.extf %13 : vector<32x128xbf16> to vector<32x128xf32>
    %cst_10 = arith.constant dense<0.000000e+00> : vector<128xf32>
    %16 = vector.multi_reduction <add>, %15, %cst_10 [0] : vector<32x128xf32> to vector<128xf32>
    %17 = vector.shape_cast %16 : vector<128xf32> to vector<1x128xf32>
    %c0_11 = arith.constant 0 : index
    %c0_12 = arith.constant 0 : index
    %c0_13 = arith.constant 0 : index
    %18 = vector.load %arg6[%c0_11, %c0_12, %c0_13] : memref<1x2x128xf32, #tpu.memory_space<vmem>>, vector<1x1x128xf32>
    %19 = vector.shape_cast %18 : vector<1x1x128xf32> to vector<1x128xf32>
    %20 = vector.shape_cast %17 : vector<1x128xf32> to vector<1x1x128xf32>
    tpu.vector_store %arg6[%c0_11, %c0_12, %c0_13], %20 {strides = array<i32>} : memref<1x2x128xf32, #tpu.memory_space<vmem>>, vector<1x1x128xf32>,
    %21 = arith.mulf %15, %15 : vector<32x128xf32>
    %cst_14 = arith.constant dense<0.000000e+00> : vector<128xf32>
    %22 = vector.multi_reduction <add>, %21, %cst_14 [0] : vector<32x128xf32> to vector<128xf32>
    %23 = vector.shape_cast %22 : vector<128xf32> to vector<1x128xf32>
    %c0_15 = arith.constant 0 : index
    %c1 = arith.constant 1 : index
    %c0_16 = arith.constant 0 : index
    %24 = vector.load %arg6[%c0_15, %c1, %c0_16] : memref<1x2x128xf32, #tpu.memory_space<vmem>>, vector<1x1x128xf32>
    %25 = vector.shape_cast %24 : vector<1x1x128xf32> to vector<1x128xf32>
    %26 = vector.shape_cast %23 : vector<1x128xf32> to vector<1x1x128xf32>
    tpu.vector_store %arg6[%c0_15, %c1, %c0_16], %26 {strides = array<i32>} : memref<1x2x128xf32, #tpu.memory_space<vmem>>, vector<1x1x128xf32>,
    return
  }
  func.func @transform_0(%arg0: i32) -> (i32, i32) {
    %c0_i32 = arith.constant 0 : i32
    %c0_i32_0 = arith.constant 0 : i32
    return %arg0, %c0_i32 : i32, i32
  }
  func.func @transform_1(%arg0: i32) -> (i32, i32) {
    %c0_i32 = arith.constant 0 : i32
    %c0_i32_0 = arith.constant 0 : i32
    %c0_i32_1 = arith.constant 0 : i32
    return %c0_i32, %c0_i32_0 : i32, i32
  }
  func.func @transform_2(%arg0: i32) -> (i32, i32) {
    %c0_i32 = arith.constant 0 : i32
    %c0_i32_0 = arith.constant 0 : i32
    %c0_i32_1 = arith.constant 0 : i32
    return %c0_i32, %c0_i32_0 : i32, i32
  }
  func.func @transform_3(%arg0: i32) -> (i32, i32) {
    %c0_i32 = arith.constant 0 : i32
    %c0_i32_0 = arith.constant 0 : i32
    %c0_i32_1 = arith.constant 0 : i32
    return %c0_i32, %c0_i32_0 : i32, i32
  }
  func.func @transform_4(%arg0: i32) -> (i32, i32) {
    %c0_i32 = arith.constant 0 : i32
    %c0_i32_0 = arith.constant 0 : i32
    return %arg0, %c0_i32 : i32, i32
  }
  func.func @transform_5(%arg0: i32) -> (i32, i32, i32) {
    %c0_i32 = arith.constant 0 : i32
    %c0_i32_0 = arith.constant 0 : i32
    %c0_i32_1 = arith.constant 0 : i32
    return %arg0, %c0_i32, %c0_i32_0 : i32, i32, i32
  }
}

</mosaic_0001>

<bundles_post_ra>
// kernel: block_neck_forward.6
= control target key start
LH: loop header
LB: loop body
LE: loop exit
PB: predicated region body
PF: predicated region fallthrough
CT: control target
= control target key end

     0   :  { %s603_s18 = smov 0   ;;  %s665_s0 = inlined_call_operand.vmem [shape: bf16[128,128], index: 0, kind: input, shape index: {}]   ;;  %s666_s1 = inlined_call_operand.vmem [shape: f32[1,128], index: 1, kind: input, shape index: {}]   ;;  %s667_s2 = inlined_call_operand.vmem [shape: f32[1,128], index: 2, kind: input, shape index: {}]   ;;  %s668_s3 = inlined_call_operand.vmem [shape: bf16[128,128], index: 3, kind: input, shape index: {}]   ;;  %s669_s4 = inlined_call_operand.vmem [shape: bf16[128,128], index: 4, kind: output, shape index: {0}]   ;;  %s670_s5 = inlined_call_operand.vmem [shape: f32[4,2,128], index: 5, kind: output, shape index: {1}]  }
   0x1 LB: > { %s609_s19 = sadd.s32 4294967295, %s571_s18   ;;  %p479_p0 = scmp.ge.s32.totalorder %s571_s18, 1  ;;  %s571_s18 = sphi %s603_s18, %s16_s18  }
   0x2   : > { %p191_p1 = scmp.lt.s32.totalorder %s571_s18, 5 }
   0x4   : > { %p192_p2 = pnand %p479_p0, %p191_p1 }
   0x5   : > { %s480_s22 = sshll.u32 (!%p192_p2), %s609_s19, 2  ;;  %p235_p4 = scmp.lt.s32.totalorder (!%p192_p2), %s609_s19, 3 }
   0x6   : > { %195 = sbr.rel (%p192_p2) target bundleno = 202 (0xca), region = 36  ;;  %p224_p3 = scmp.lt.s32.totalorder (!%p192_p2), %s480_s22, 15 }
   0xb   : > { %v526_v0 = vld [vmem:[%s668_s3 + $0x38] sm:$0xff]  ;;  %v525_v1 = vld [vmem:[%s668_s3 + $0x30] sm:$0xff]  ;;  %s672_s22 = smov (!%p224_p3, %s480_s22), 15  ;;  %v524_v2 = vld [vmem:[%s668_s3 + $0x28] sm:$0xff]  ;;  %s674_s19 = smov (!%p235_p4, %s609_s19), 3 }
   0xc   : > { %333 = vmatpush.bf16.msra.mxu0 %v526_v0  ;;  %547 = vmatpush.bf16.msra.mxu1 %v526_v0  ;;  %s481_s25 = sshll.u32 %s672_s22, 2  ;;  %v523_v3 = vld [vmem:[%s668_s3 + $0x20] sm:$0xff]  ;;  %v522_v11 = vld [vmem:[%s668_s3 + $0x18] sm:$0xff]  ;;  %v521_v17 = vld [vmem:[%s668_s3 + $0x10] sm:$0xff]  ;;  %s484_s22 = sshll.u32 %s674_s19, 1 }
   0xd   : > { %s227_s30 = scalar_lea.vmem %s665_s0, %s481_s25  ;;  %v563_v8 = vld [vmem:[%s666_s1] ss:$0 sm:$0xff]  ;;  %v520_v22 = vld [vmem:[%s668_s3 + $0x8] sm:$0xff]  ;;  %s233_s26 = scalar_lea.vmem %s669_s4, %s481_s25 }
   0xe   : > { %v528_v4 = vld [vmem:[%s227_s30] sm:$0xff]   ;;  %v545_v5 = vld [vmem:[%s227_s30 + $0x8] sm:$0xff]   ;;  %s238_s28 = scalar_lea.vmem %s670_s5, %s484_s22 }
   0xf   : > { %v529_v6 = vunpack.c.l.bf16 %v528_v4  ;;  %v530_v7 = vunpack.c.h.bf16 %v528_v4  ;;  %v533_v9 = vunpack.c.l.bf16 %v545_v5  ;;  %v534_v10 = vunpack.c.h.bf16 %v545_v5  ;;  %v564_v14 = vld [vmem:[%s667_s2] ss:$0 sm:$0xff] }
  0x10   : > { %334 = vmatpush.bf16.msra.mxu0 %v525_v1  ;;  %548 = vmatpush.bf16.msra.mxu1 %v525_v1  ;;  %v519_v27 = vld [vmem:[%s668_s3] sm:$0xff] }
  0x11   : > { %v251_v12 = vmul.f32 %v563_v8, %v529_v6  ;;  %v252_v13 = vmul.f32 %v563_v8, %v530_v7  ;;  %v253_v15 = vmul.f32 %v563_v8, %v533_v9  ;;  %v254_v16 = vmul.f32 %v563_v8, %v534_v10 }
  0x13   : > { %v259_v18 = vadd.f32 %v564_v14, %v251_v12  ;;  %v260_v19 = vadd.f32 %v564_v14, %v252_v13  ;;  %v261_v20 = vadd.f32 %v564_v14, %v253_v15  ;;  %v262_v21 = vadd.f32 %v564_v14, %v254_v16 }
  0x14   : > { %335 = vmatpush.bf16.msra.mxu0 %v524_v2  ;;  %549 = vmatpush.bf16.msra.mxu1 %v524_v2 }
  0x15   : > { %v263_v23 = vmax.f32 %v259_v18, 0.0  ;;  %v264_v24 = vmax.f32 %v260_v19, 0.0  ;;  %v265_v25 = vmax.f32 %v261_v20, 0.0  ;;  %v266_v26 = vmax.f32 %v262_v21, 0.0 }
  0x17   : > { %v267_v28 = vpack.c.bf16 %v264_v24, %v263_v23  ;;  %v268_v29 = vpack.c.bf16 %v266_v26, %v265_v25 }
  0x18   : > { %336 = vmatpush.bf16.msra.mxu0 %v523_v3  ;;  %550 = vmatpush.bf16.msra.mxu1 %v523_v3 }
  0x1c   : > { %337 = vmatpush.bf16.msra.mxu0 %v522_v11  ;;  %551 = vmatpush.bf16.msra.mxu1 %v522_v11 }
  0x20   : > { %338 = vmatpush.bf16.msra.mxu0 %v521_v17  ;;  %552 = vmatpush.bf16.msra.mxu1 %v521_v17 }
  0x24   : > { %339 = vmatpush.bf16.msra.mxu0 %v520_v22  ;;  %553 = vmatpush.bf16.msra.mxu1 %v520_v22 }
  0x28   : > { %340 = vmatpush.bf16.msra.mxu0 %v519_v27  ;;  %554 = vmatpush.bf16.msra.mxu1 %v519_v27 }
  0x2b   : > { %341 = vmatmul.bf16.vlgmr.msra.gmra.mxu0 %v267_v28  ;;  %346 = vmatmul.bf16.vlgmr.msra.gmra.mxu1 %v268_v29 }
  0xa8   : > { %v342_v30 = vpop.f32.mrf.mxu0  ;;  %v347_v31 = vpop.f32.mrf.mxu1 }
  0xa9   : > { %v352_v32 = vpack.c.bf16 %v342_v30, %v342_v30  ;;  %v354_v33 = vpack.c.bf16 %v347_v31, %v347_v31 }
  0xab   : > { %v360_v34 = vunpack.c.l.bf16 %v352_v32  ;;  %v362_v41 = vunpack.c.l.bf16 %v354_v33 }
  0xad   : > { %v374_v43 = vmul.f32 %v360_v34, %v360_v34  ;;  %v376_v47 = vmul.f32 %v362_v41, %v362_v41 }
  0xb0   : > { %v344_v35 = vpop.f32.mrf.mxu0  ;;  %v349_v36 = vpop.f32.mrf.mxu1 }
  0xb1   : > { %v353_v37 = vpack.c.bf16 %v344_v35, %v344_v35  ;;  %v538_v38 = vpack.c.bf16 %v344_v35, %v342_v30  ;;  %v355_v39 = vpack.c.bf16 %v349_v36, %v349_v36  ;;  %v543_v40 = vpack.c.bf16 %v349_v36, %v347_v31 }
  0xb3   : > { %539 = vst [vmem:[%s233_s26] sm:$0xff] %v538_v38   ;;  %v361_v42 = vunpack.c.l.bf16 %v353_v37  ;;  %v363_v46 = vunpack.c.l.bf16 %v355_v39 }
  0xb4   : > { %546 = vst [vmem:[%s233_s26 + $0x8] sm:$0xff] %v543_v40  }
  0xb5   : > { %v364_v44 = vadd.f32 %v361_v42, %v360_v34  ;;  %v375_v45 = vmul.f32 %v361_v42, %v361_v42  ;;  %v377_v51 = vmul.f32 %v363_v46, %v363_v46 }
  0xb7   : > { %v378_v48 = vadd.f32 %v375_v45, %v374_v43  ;;  %v365_v49 = vadd.f32 %v364_v44, %v362_v41 }
  0xb9   : > { %v366_v50 = vadd.f32 %v365_v49, %v363_v46  ;;  %v379_v52 = vadd.f32 %v378_v48, %v376_v47 }
  0xbb   : > { %v367_v53 = vrot.slane %v366_v50, 4  ;;  %v380_v54 = vadd.f32 %v379_v52, %v377_v51 }
  0xbd   : > { %v368_v55 = vadd.f32 %v367_v53, %v366_v50  ;;  %v381_v56 = vrot.slane %v380_v54, 4 }
  0xbf   : > { %v369_v57 = vrot.slane %v368_v55, 2  ;;  %v382_v58 = vadd.f32 %v381_v56, %v380_v54 }
  0xc1   : > { %v370_v59 = vadd.f32 %v369_v57, %v368_v55  ;;  %v383_v60 = vrot.slane %v382_v58, 2 }
  0xc3   : > { %v371_v61 = vrot.slane %v370_v59, 1  ;;  %v384_v62 = vadd.f32 %v383_v60, %v382_v58 }
  0xc5   : > { %v372_v63 = vadd.f32 %v371_v61, %v370_v59  ;;  %v385_v0 = vrot.slane %v384_v62, 1 }
  0xc7   : > { %373 = vst [vmem:[%s238_s28] sm:$0x1] %v372_v63  ;;  %v386_v1 = vadd.f32 %v385_v0, %v384_v62 }
  0xc9   : > { %387 = vst [vmem:[%s238_s28 + $0x1] sm:$0x1] %v386_v1 }
  0xca PF: > { %s16_s18 = sadd.s32 1, %s571_s18  }
  0xcb   : > { %p13_p5 = scmp.ge.s32.totalorder %s16_s18, 6  }
  0xcd   :  { %15 = sbr.rel (!%p13_p5) target bundleno = 1 (0x1), region = 78 }

// kernel: block_neck_forward.7
= control target key start
LH: loop header
LB: loop body
LE: loop exit
PB: predicated region body
PF: predicated region fallthrough
CT: control target
= control target key end

     0   :  { %s491_s21 = smov 0   ;;  %s527_s0 = inlined_call_operand.vmem [shape: bf16[128,128], index: 0, kind: input, shape index: {}]   ;;  %s528_s1 = inlined_call_operand.vmem [shape: bf16[128,128], index: 1, kind: input, shape index: {}]   ;;  %s529_s2 = inlined_call_operand.vmem [shape: f32[1,128], index: 2, kind: input, shape index: {}]   ;;  %s530_s3 = inlined_call_operand.vmem [shape: f32[1,128], index: 3, kind: input, shape index: {}]   ;;  %s531_s4 = inlined_call_operand.vmem [shape: f32[1,128], index: 4, kind: input, shape index: {}]   ;;  %s532_s5 = inlined_call_operand.vmem [shape: f32[1,128], index: 5, kind: input, shape index: {}]   ;;  %s533_s6 = inlined_call_operand.vmem [shape: f32[128,128], index: 6, kind: output, shape index: {}]  }
   0x1 LB: > { %s405_s22 = sadd.s32 4294967295, %s454_s21   ;;  %p409_p0 = scmp.ge.s32.totalorder %s454_s21, 1  ;;  %s454_s21 = sphi %s491_s21, %s16_s21  }
   0x2   : > { %p224_p1 = scmp.lt.s32.totalorder %s454_s21, 5 }
   0x4   : > { %p225_p2 = pnand %p409_p0, %p224_p1 }
   0x5   : > { %s410_s23 = sshll.u32 (!%p225_p2), %s405_s22, 2 }
   0x6   : > { %228 = sbr.rel (%p225_p2) target bundleno = 30 (0x1e), region = 44  ;;  %p260_p3 = scmp.lt.s32.totalorder (!%p225_p2), %s410_s23, 15 }
   0xb   : > { %s535_s23 = smov (!%p260_p3, %s410_s23), 15  ;;  %v444_v0 = vld [vmem:[%s529_s2] ss:$0 sm:$0xff] }
   0xc   : > { %s411_s24 = sshll.u32 %s535_s23, 2  ;;  %v446_v1 = vld [vmem:[%s531_s4] ss:$0 sm:$0xff]  ;;  %s415_s15 = sshll.u32 %s535_s23, 3 }
   0xd   : > { %s263_s27 = scalar_lea.vmem %s527_s0, %s411_s24  ;;  %s269_s30 = scalar_lea.vmem %s528_s1, %s411_s24  ;;  %v445_v6 = vld [vmem:[%s530_s3] ss:$0 sm:$0xff] }
   0xe   : > { %v419_v2 = vld [vmem:[%s263_s27] sm:$0xff]   ;;  %v434_v4 = vld [vmem:[%s263_s27 + $0x8] sm:$0xff]   ;;  %s275_s18 = scalar_lea.vmem %s533_s6, %s415_s15 }
   0xf   : > { %v427_v3 = vld [vmem:[%s269_s30] sm:$0xff]   ;;  %v420_v5 = vunpack.c.l.bf16 %v419_v2  ;;  %v421_v9 = vunpack.c.h.bf16 %v419_v2  ;;  %v435_v11 = vld [vmem:[%s269_s30 + $0x8] sm:$0xff]   ;;  %v424_v12 = vunpack.c.l.bf16 %v434_v4  ;;  %v425_v14 = vunpack.c.h.bf16 %v434_v4 }
  0x10   : > { %v428_v7 = vunpack.c.l.bf16 %v427_v3  ;;  %v447_v8 = vld [vmem:[%s532_s5] ss:$0 sm:$0xff]  ;;  %v429_v10 = vunpack.c.h.bf16 %v427_v3  ;;  %v432_v13 = vunpack.c.l.bf16 %v435_v11  ;;  %v433_v15 = vunpack.c.h.bf16 %v435_v11 }
  0x11   : > { %v289_v16 = vmul.f32 %v444_v0, %v420_v5  ;;  %v290_v18 = vmul.f32 %v444_v0, %v421_v9  ;;  %v291_v20 = vmul.f32 %v444_v0, %v424_v12  ;;  %v292_v22 = vmul.f32 %v444_v0, %v425_v14 }
  0x12   : > { %v313_v17 = vmul.f32 %v446_v1, %v428_v7  ;;  %v314_v19 = vmul.f32 %v446_v1, %v429_v10  ;;  %v315_v21 = vmul.f32 %v446_v1, %v432_v13  ;;  %v316_v23 = vmul.f32 %v446_v1, %v433_v15 }
  0x13   : > { %v297_v24 = vadd.f32 %v445_v6, %v289_v16  ;;  %v298_v26 = vadd.f32 %v445_v6, %v290_v18  ;;  %v299_v28 = vadd.f32 %v445_v6, %v291_v20  ;;  %v300_v30 = vadd.f32 %v445_v6, %v292_v22 }
  0x14   : > { %v321_v25 = vadd.f32 %v447_v8, %v313_v17  ;;  %v322_v27 = vadd.f32 %v447_v8, %v314_v19  ;;  %v323_v29 = vadd.f32 %v447_v8, %v315_v21  ;;  %v324_v31 = vadd.f32 %v447_v8, %v316_v23 }
  0x16   : > { %v325_v32 = vadd.f32 %v321_v25, %v297_v24  ;;  %v326_v33 = vadd.f32 %v322_v27, %v298_v26  ;;  %v327_v34 = vadd.f32 %v323_v29, %v299_v28  ;;  %v328_v35 = vadd.f32 %v324_v31, %v300_v30 }
  0x18   : > { %v329_v36 = vmax.f32 %v325_v32, 0.0  ;;  %v330_v37 = vmax.f32 %v326_v33, 0.0  ;;  %v331_v38 = vmax.f32 %v327_v34, 0.0  ;;  %v332_v39 = vmax.f32 %v328_v35, 0.0 }
  0x1a   : > { %333 = vst [vmem:[%s275_s18] sm:$0xff] %v329_v36 }
  0x1b   : > { %334 = vst [vmem:[%s275_s18 + $0x8] sm:$0xff] %v330_v37 }
  0x1c   : > { %335 = vst [vmem:[%s275_s18 + $0x10] sm:$0xff] %v331_v38 }
  0x1d   : > { %336 = vst [vmem:[%s275_s18 + $0x18] sm:$0xff] %v332_v39 }
  0x1e PF: > { %s16_s21 = sadd.s32 1, %s454_s21  }
  0x1f   : > { %p13_p4 = scmp.ge.s32.totalorder %s16_s21, 6  }
  0x21   :  { %15 = sbr.rel (!%p13_p4) target bundleno = 1 (0x1), region = 77 }

// kernel: block_neck_forward.4
= control target key start
LH: loop header
LB: loop body
LE: loop exit
PB: predicated region body
PF: predicated region fallthrough
CT: control target
= control target key end

     0   :  { %s889_s21 = smov 0   ;;  %s981_s0 = inlined_call_operand.vmem [shape: bf16[128,128], index: 0, kind: input, shape index: {}]   ;;  %s982_s1 = inlined_call_operand.vmem [shape: bf16[128,128], index: 1, kind: input, shape index: {}]   ;;  %s983_s2 = inlined_call_operand.vmem [shape: bf16[128,128], index: 2, kind: input, shape index: {}]   ;;  %s984_s3 = inlined_call_operand.vmem [shape: bf16[128,128], index: 3, kind: output, shape index: {0}]   ;;  %s985_s4 = inlined_call_operand.vmem [shape: bf16[128,128], index: 4, kind: output, shape index: {1}]   ;;  %s986_s5 = inlined_call_operand.vmem [shape: f32[4,2,128], index: 5, kind: output, shape index: {2}]   ;;  %s987_s6 = inlined_call_operand.vmem [shape: f32[4,2,128], index: 6, kind: output, shape index: {3}]  }
   0x1 LB: > { %s895_s22 = sadd.s32 4294967295, %s852_s21   ;;  %p699_p0 = scmp.ge.s32.totalorder %s852_s21, 1  ;;  %s852_s21 = sphi %s889_s21, %s17_s21  }
   0x2   : > { %p220_p1 = scmp.lt.s32.totalorder %s852_s21, 5 }
   0x4   : > { %p221_p2 = pnand %p699_p0, %p220_p1 }
   0x5   : > { %s700_s15 = sshll.u32 (!%p221_p2), %s895_s22, 2  ;;  %p281_p4 = scmp.lt.s32.totalorder (!%p221_p2), %s895_s22, 3 }
   0x6   : > { %224 = sbr.rel (%p221_p2) target bundleno = 205 (0xcd), region = 32  ;;  %p264_p3 = scmp.lt.s32.totalorder (!%p221_p2), %s700_s15, 15 }
   0xb   : > { %v791_v0 = vld [vmem:[%s982_s1 + $0x38] sm:$0xff]  ;;  %v790_v2 = vld [vmem:[%s982_s1 + $0x30] sm:$0xff]  ;;  %v789_v4 = vld [vmem:[%s982_s1 + $0x28] sm:$0xff]  ;;  %s989_s15 = smov (!%p264_p3, %s700_s15), 15  ;;  %s991_s22 = smov (!%p281_p4, %s895_s22), 3 }
   0xc   : > { %v799_v1 = vld [vmem:[%s983_s2 + $0x38] sm:$0xff]  ;;  %369 = vmatpush.bf16.msra.mxu0 %v791_v0  ;;  %822 = vmatpush.bf16.msra.mxu2 %v791_v0  ;;  %v798_v3 = vld [vmem:[%s983_s2 + $0x30] sm:$0xff]  ;;  %v797_v5 = vld [vmem:[%s983_s2 + $0x28] sm:$0xff]  ;;  %s942_s30 = sshll.u32 %s989_s15, 2  ;;  %s706_s20 = sshll.u32 %s991_s22, 1 }
   0xd   : > { %452 = vmatpush.bf16.msra.mxu1 %v799_v1  ;;  %830 = vmatpush.bf16.msra.mxu3 %v799_v1  ;;  %v788_v6 = vld [vmem:[%s982_s1 + $0x20] sm:$0xff]  ;;  %v787_v8 = vld [vmem:[%s982_s1 + $0x18] sm:$0xff]  ;;  %v786_v10 = vld [vmem:[%s982_s1 + $0x10] sm:$0xff]  ;;  %s267_s11 = scalar_lea.vmem %s981_s0, %s942_s30  ;;  %s958_s16 = scalar_lea.vmem %s984_s3, %s942_s30 }
   0xe   : > { %v796_v7 = vld [vmem:[%s983_s2 + $0x20] sm:$0xff]  ;;  %v795_v9 = vld [vmem:[%s983_s2 + $0x18] sm:$0xff]  ;;  %v794_v11 = vld [vmem:[%s983_s2 + $0x10] sm:$0xff]  ;;  %s964_s19 = scalar_lea.vmem %s985_s4, %s942_s30  ;;  %s284_s25 = scalar_lea.vmem %s986_s5, %s706_s20 }
   0xf   : > { %v785_v12 = vld [vmem:[%s982_s1 + $0x8] sm:$0xff]  ;;  %v784_v14 = vld [vmem:[%s982_s1] sm:$0xff]  ;;  %s288_s28 = scalar_lea.vmem %s987_s6, %s706_s20 }
  0x10   : > { %370 = vmatpush.bf16.msra.mxu0 %v790_v2  ;;  %823 = vmatpush.bf16.msra.mxu2 %v790_v2  ;;  %v793_v13 = vld [vmem:[%s983_s2 + $0x8] sm:$0xff]  ;;  %v792_v15 = vld [vmem:[%s983_s2] sm:$0xff] }
  0x11   : > { %453 = vmatpush.bf16.msra.mxu1 %v798_v3  ;;  %831 = vmatpush.bf16.msra.mxu3 %v798_v3  ;;  %v782_v16 = vld [vmem:[%s267_s11] sm:$0xff]  ;;  %v783_v17 = vld [vmem:[%s267_s11 + $0x8] sm:$0xff] }
  0x14   : > { %371 = vmatpush.bf16.msra.mxu0 %v789_v4  ;;  %824 = vmatpush.bf16.msra.mxu2 %v789_v4 }
  0x15   : > { %454 = vmatpush.bf16.msra.mxu1 %v797_v5  ;;  %832 = vmatpush.bf16.msra.mxu3 %v797_v5 }
  0x18   : > { %372 = vmatpush.bf16.msra.mxu0 %v788_v6  ;;  %825 = vmatpush.bf16.msra.mxu2 %v788_v6 }
  0x19   : > { %455 = vmatpush.bf16.msra.mxu1 %v796_v7  ;;  %833 = vmatpush.bf16.msra.mxu3 %v796_v7 }
  0x1c   : > { %373 = vmatpush.bf16.msra.mxu0 %v787_v8  ;;  %826 = vmatpush.bf16.msra.mxu2 %v787_v8 }
  0x1d   : > { %456 = vmatpush.bf16.msra.mxu1 %v795_v9  ;;  %834 = vmatpush.bf16.msra.mxu3 %v795_v9 }
  0x20   : > { %374 = vmatpush.bf16.msra.mxu0 %v786_v10  ;;  %827 = vmatpush.bf16.msra.mxu2 %v786_v10 }
  0x21   : > { %457 = vmatpush.bf16.msra.mxu1 %v794_v11  ;;  %835 = vmatpush.bf16.msra.mxu3 %v794_v11 }
  0x24   : > { %375 = vmatpush.bf16.msra.mxu0 %v785_v12  ;;  %828 = vmatpush.bf16.msra.mxu2 %v785_v12 }
  0x25   : > { %458 = vmatpush.bf16.msra.mxu1 %v793_v13  ;;  %836 = vmatpush.bf16.msra.mxu3 %v793_v13 }
  0x28   : > { %376 = vmatpush.bf16.msra.mxu0 %v784_v14  ;;  %829 = vmatpush.bf16.msra.mxu2 %v784_v14 }
  0x29   : > { %459 = vmatpush.bf16.msra.mxu1 %v792_v15  ;;  %837 = vmatpush.bf16.msra.mxu3 %v792_v15 }
  0x2b   : > { %377 = vmatmul.bf16.vlgmr.msra.gmra.mxu0 %v782_v16  ;;  %382 = vmatmul.bf16.vlgmr.msra.gmra.mxu2 %v783_v17 }
  0x2c   : > { %460 = vmatmul.bf16.vlgmr.msra.gmra.mxu1 %v782_v16  ;;  %465 = vmatmul.bf16.vlgmr.msra.gmra.mxu3 %v783_v17 }
  0xa8   : > { %v378_v18 = vpop.f32.mrf.mxu0 }
  0xa9   : > { %v461_v19 = vpop.f32.mrf.mxu1  ;;  %v471_v20 = vpack.c.bf16 %v378_v18, %v378_v18 }
  0xaa   : > { %v475_v21 = vpack.c.bf16 %v461_v19, %v461_v19 }
  0xab   : > { %v487_v25 = vunpack.c.l.bf16 %v471_v20 }
  0xac   : > { %v515_v30 = vunpack.c.l.bf16 %v475_v21 }
  0xad   : > { %v501_v36 = vmul.f32 %v487_v25, %v487_v25 }
  0xae   : > { %v383_v22 = vpop.f32.mrf.mxu2  ;;  %v529_v40 = vmul.f32 %v515_v30, %v515_v30 }
  0xaf   : > { %v466_v23 = vpop.f32.mrf.mxu3  ;;  %v473_v26 = vpack.c.bf16 %v383_v22, %v383_v22 }
  0xb0   : > { %v380_v24 = vpop.f32.mrf.mxu0  ;;  %v477_v31 = vpack.c.bf16 %v466_v23, %v466_v23 }
  0xb1   : > { %v472_v27 = vpack.c.bf16 %v380_v24, %v380_v24  ;;  %v803_v28 = vpack.c.bf16 %v380_v24, %v378_v18  ;;  %v463_v29 = vpop.f32.mrf.mxu1  ;;  %v489_v37 = vunpack.c.l.bf16 %v473_v26 }
  0xb2   : > { %v476_v32 = vpack.c.bf16 %v463_v29, %v463_v29  ;;  %v813_v33 = vpack.c.bf16 %v463_v29, %v461_v19  ;;  %v517_v41 = vunpack.c.l.bf16 %v477_v31 }
  0xb3   : > { %804 = vst [vmem:[%s958_s16] sm:$0xff] %v803_v28   ;;  %v488_v34 = vunpack.c.l.bf16 %v472_v27  ;;  %v503_v52 = vmul.f32 %v489_v37, %v489_v37 }
  0xb4   : > { %814 = vst [vmem:[%s964_s19] sm:$0xff] %v813_v33   ;;  %v516_v35 = vunpack.c.l.bf16 %v476_v32  ;;  %v531_v55 = vmul.f32 %v517_v41, %v517_v41 }
  0xb5   : > { %v491_v38 = vadd.f32 %v488_v34, %v487_v25  ;;  %v502_v39 = vmul.f32 %v488_v34, %v488_v34 }
  0xb6   : > { %v519_v42 = vadd.f32 %v516_v35, %v515_v30  ;;  %v530_v43 = vmul.f32 %v516_v35, %v516_v35  ;;  %v385_v44 = vpop.f32.mrf.mxu2 }
  0xb7   : > { %v505_v45 = vadd.f32 %v502_v39, %v501_v36  ;;  %v474_v46 = vpack.c.bf16 %v385_v44, %v385_v44  ;;  %v808_v47 = vpack.c.bf16 %v385_v44, %v383_v22  ;;  %v468_v48 = vpop.f32.mrf.mxu3  ;;  %v492_v54 = vadd.f32 %v491_v38, %v489_v37 }
  0xb8   : > { %v533_v49 = vadd.f32 %v530_v43, %v529_v40  ;;  %v478_v50 = vpack.c.bf16 %v468_v48, %v468_v48  ;;  %v818_v51 = vpack.c.bf16 %v468_v48, %v466_v23  ;;  %v520_v57 = vadd.f32 %v519_v42, %v517_v41 }
  0xb9   : > { %820 = vst [vmem:[%s958_s16 + $0x8] sm:$0xff] %v808_v47   ;;  %v490_v53 = vunpack.c.l.bf16 %v474_v46  ;;  %v506_v60 = vadd.f32 %v505_v45, %v503_v52 }
  0xba   : > { %821 = vst [vmem:[%s964_s19 + $0x8] sm:$0xff] %v818_v51   ;;  %v518_v56 = vunpack.c.l.bf16 %v478_v50  ;;  %v534_v63 = vadd.f32 %v533_v49, %v531_v55 }
  0xbb   : > { %v493_v58 = vadd.f32 %v492_v54, %v490_v53  ;;  %v504_v59 = vmul.f32 %v490_v53, %v490_v53 }
  0xbc   : > { %v521_v61 = vadd.f32 %v520_v57, %v518_v56  ;;  %v532_v62 = vmul.f32 %v518_v56, %v518_v56 }
  0xbd   : > { %v494_v0 = vrot.slane %v493_v58, 4  ;;  %v507_v1 = vadd.f32 %v506_v60, %v504_v59 }
  0xbe   : > { %v522_v2 = vrot.slane %v521_v61, 4  ;;  %v535_v3 = vadd.f32 %v534_v63, %v532_v62 }
  0xbf   : > { %v495_v4 = vadd.f32 %v494_v0, %v493_v58  ;;  %v508_v5 = vrot.slane %v507_v1, 4 }
  0xc0   : > { %v523_v6 = vadd.f32 %v522_v2, %v521_v61  ;;  %v536_v7 = vrot.slane %v535_v3, 4 }
  0xc1   : > { %v496_v8 = vrot.slane %v495_v4, 2  ;;  %v509_v9 = vadd.f32 %v508_v5, %v507_v1 }
  0xc2   : > { %v524_v10 = vrot.slane %v523_v6, 2  ;;  %v537_v11 = vadd.f32 %v536_v7, %v535_v3 }
  0xc3   : > { %v497_v12 = vadd.f32 %v496_v8, %v495_v4  ;;  %v510_v13 = vrot.slane %v509_v9, 2 }
  0xc4   : > { %v525_v14 = vadd.f32 %v524_v10, %v523_v6  ;;  %v538_v15 = vrot.slane %v537_v11, 2 }
  0xc5   : > { %v498_v16 = vrot.slane %v497_v12, 1  ;;  %v511_v17 = vadd.f32 %v510_v13, %v509_v9 }
  0xc6   : > { %v526_v18 = vrot.slane %v525_v14, 1  ;;  %v539_v19 = vadd.f32 %v538_v15, %v537_v11 }
  0xc7   : > { %v499_v20 = vadd.f32 %v498_v16, %v497_v12  ;;  %v512_v21 = vrot.slane %v511_v17, 1 }
  0xc8   : > { %v527_v22 = vadd.f32 %v526_v18, %v525_v14  ;;  %v540_v23 = vrot.slane %v539_v19, 1 }
  0xc9   : > { %500 = vst [vmem:[%s284_s25] sm:$0x1] %v499_v20  ;;  %v513_v24 = vadd.f32 %v512_v21, %v511_v17 }
  0xca   : > { %528 = vst [vmem:[%s288_s28] sm:$0x1] %v527_v22  ;;  %v541_v25 = vadd.f32 %v540_v23, %v539_v19 }
  0xcb   : > { %514 = vst [vmem:[%s284_s25 + $0x1] sm:$0x1] %v513_v24 }
  0xcc   : > { %542 = vst [vmem:[%s288_s28 + $0x1] sm:$0x1] %v541_v25 }
  0xcd PF: > { %s17_s21 = sadd.s32 1, %s852_s21  }
  0xce   : > { %p14_p5 = scmp.ge.s32.totalorder %s17_s21, 6  }
  0xd0   :  { %16 = sbr.rel (!%p14_p5) target bundleno = 1 (0x1), region = 98 }

// kernel: block_neck_forward.5
= control target key start
LH: loop header
LB: loop body
LE: loop exit
PB: predicated region body
PF: predicated region fallthrough
CT: control target
= control target key end

     0   :  { %s2171_s18 = smov 0   ;;  %s2675_s0 = inlined_call_operand.vmem [shape: bf16[2,8,8,128], index: 0, kind: input, shape index: {}]   ;;  %s2676_s1 = inlined_call_operand.vmem [shape: f32[1,1,128], index: 1, kind: input, shape index: {}]   ;;  %s2677_s2 = inlined_call_operand.vmem [shape: f32[1,1,128], index: 2, kind: input, shape index: {}]   ;;  %s2678_s3 = inlined_call_operand.vmem [shape: bf16[9,128,128], index: 3, kind: input, shape index: {}]   ;;  %s2679_s4 = inlined_call_operand.vmem [shape: bf16[2,8,8,128], index: 4, kind: output, shape index: {0}]   ;;  %s2680_s5 = inlined_call_operand.vmem [shape: f32[2,2,128], index: 5, kind: output, shape index: {1}]  }
   0x1 LB: > { %s1510_s19 = sadd.s32 4294967295, %s2137_s18   ;;  %p1514_p0 = scmp.ge.s32.totalorder %s2137_s18, 1  ;;  %s2137_s18 = sphi %s2171_s18, %s16_s18  }
   0x2   : > { %p190_p1 = scmp.lt.s32.totalorder %s2137_s18, 3 }
   0x4   : > { %p191_p2 = pnand %p1514_p0, %p190_p1 }
   0x5   : > { %p222_p3 = scmp.lt.s32.totalorder (!%p191_p2), %s1510_s19, 1 }
   0x6   : > { %194 = sbr.rel (%p191_p2) target bundleno = 350 (0x15e), region = 36 }
   0xb   : > { %v1955_v0 = vld [vmem:[%s2678_s3 + $0x78] sm:$0xff]  ;;  %v2139_v2 = vmov 0.0   ;;  %v1954_v3 = vld [vmem:[%s2678_s3 + $0x70] sm:$0xff]  ;;  %s2686_s19 = smov (!%p222_p3, %s1510_s19), 1  ;;  %v1953_v6 = vld [vmem:[%s2678_s3 + $0x68] sm:$0xff]  ;;  %vm308_vm0 = vcmask 1040384  }
   0xc   : > { %v1963_v1 = vld [vmem:[%s2678_s3 + $0xb8] sm:$0xff]  ;;  %325 = vst [vmem:[#allocation2] sm:$0xff] %v2139_v2  ;;  %2046 = vmatpush.bf16.msra.mxu1 %v1955_v0  ;;  %450 = vmatpush.bf16.msra.mxu0 %v1955_v0  ;;  %v1962_v4 = vld [vmem:[%s2678_s3 + $0xb0] sm:$0xff]  ;;  %s1938_s30 = sshll.u32 %s2686_s19, 5  ;;  %v2219_v10 = vld [vmem:[%s2676_s1] ss:$0 sm:$0xff] }
   0xd   : > { %326 = vst [vmem:[#allocation2 + $0x8] sm:$0x3] %v2139_v2  ;;  %633 = vmatpush.bf16.msra.mxu2 %v1963_v1  ;;  %v1971_v5 = vld [vmem:[%s2678_s3 + $0xf8] sm:$0xff]  ;;  %v1970_v7 = vld [vmem:[%s2678_s3 + $0xf0] sm:$0xff]  ;;  %s2212_s12 = scalar_lea.vmem %s2675_s0, %s1938_s30  ;;  %v1961_v11 = vld [vmem:[%s2678_s3 + $0xa8] sm:$0xff]  ;;  %vm2140_vm3 = vmmov 1   ;;  %s2651_s17 = scalar_lea.vmem %s2679_s4, %s1938_s30 }
   0xe   : > { %343 = vst [vmem:[#allocation2 + $0x90] sm:$0xff] %v2139_v2  ;;  %748 = vmatpush.bf16.msra.mxu3 %v1971_v5  ;;  %v2040_v8 = vld [vmem:[%s2212_s12 + $0x8] sm:$0xff]   ;;  %v2041_v9 = vld [vmem:[%s2212_s12 + $0x10] sm:$0xff]   ;;  %v2227_v14 = vld [vmem:[%s2677_s2] ss:$0 sm:$0xff]  ;;  %s1519_s30 = sshll.u32 %s2686_s19, 1 }
   0xf   : > { %344 = vst [vmem:[#allocation2 + $0x98] sm:$0x3] %v2139_v2  ;;  %v2019_v12 = vunpack.c.h.bf16 %v2040_v8  ;;  %v2022_v13 = vunpack.c.l.bf16 %v2041_v9  ;;  %v2023_v15 = vunpack.c.h.bf16 %v2041_v9  ;;  %v2018_v16 = vunpack.c.l.bf16 %v2040_v8  ;;  %v1969_v17 = vld [vmem:[%s2678_s3 + $0xe8] sm:$0xff]  ;;  %v2013_v20 = vld [vmem:[%s2212_s12] sm:$0xff]   ;;  %v2252_v35 = vld [vmem:[%s2212_s12 + $0x18] sm:$0xff]   ;;  %s235_s22 = scalar_lea.vmem %s2680_s5, %s1519_s30 }
  0x10   : > { %2047 = vmatpush.bf16.msra.mxu1 %v1954_v3  ;;  %451 = vmatpush.bf16.msra.mxu0 %v1954_v3  ;;  %v1952_v22 = vld [vmem:[%s2678_s3 + $0x60] sm:$0xff]  ;;  %v2014_v23 = vunpack.c.l.bf16 %v2013_v20  ;;  %v2015_v24 = vunpack.c.h.bf16 %v2013_v20  ;;  %v1951_v37 = vld [vmem:[%s2678_s3 + $0x58] sm:$0xff]  ;;  %v2026_v39 = vunpack.c.l.bf16 %v2252_v35  ;;  %v1950_v53 = vld [vmem:[%s2678_s3 + $0x50] sm:$0xff] }
  0x11   : > { %634 = vmatpush.bf16.msra.mxu2 %v1962_v4  ;;  %v259_v18 = vmul.f32 %v2219_v10, %v2019_v12  ;;  %v260_v19 = vmul.f32 %v2219_v10, %v2022_v13  ;;  %v261_v21 = vmul.f32 %v2219_v10, %v2023_v15  ;;  %v1960_v25 = vld [vmem:[%s2678_s3 + $0xa0] sm:$0xff]  ;;  %v258_v29 = vmul.f32 %v2219_v10, %v2018_v16  ;;  %v1959_v41 = vld [vmem:[%s2678_s3 + $0x98] sm:$0xff]  ;;  %v1958_v57 = vld [vmem:[%s2678_s3 + $0x90] sm:$0xff] }
  0x12   : > { %749 = vmatpush.bf16.msra.mxu3 %v1970_v7  ;;  %v256_v30 = vmul.f32 %v2219_v10, %v2014_v23  ;;  %v257_v31 = vmul.f32 %v2219_v10, %v2015_v24  ;;  %v1968_v34 = vld [vmem:[%s2678_s3 + $0xe0] sm:$0xff]  ;;  %v262_v46 = vmul.f32 %v2219_v10, %v2026_v39  ;;  %v1967_v51 = vld [vmem:[%s2678_s3 + $0xd8] sm:$0xff]  ;;  %v1966_v62 = vld [vmem:[%s2678_s3 + $0xd0] sm:$0xff] }
  0x13   : > { %v271_v26 = vadd.f32 %v2227_v14, %v259_v18  ;;  %v272_v27 = vadd.f32 %v2227_v14, %v260_v19  ;;  %v273_v28 = vadd.f32 %v2227_v14, %v261_v21  ;;  %v270_v44 = vadd.f32 %v2227_v14, %v258_v29  ;;  %v1949_v1 = vld [vmem:[%s2678_s3 + $0x48] sm:$0xff]  ;;  %v1948_v12 = vld [vmem:[%s2678_s3 + $0x40] sm:$0xff]  ;;  %v1947_v15 = vld [vmem:[%s2678_s3 + $0x38] sm:$0xff] }
  0x14   : > { %2048 = vmatpush.bf16.msra.mxu1 %v1953_v6  ;;  %452 = vmatpush.bf16.msra.mxu0 %v1953_v6  ;;  %v268_v38 = vadd.f32 %v2227_v14, %v256_v30  ;;  %v269_v40 = vadd.f32 %v2227_v14, %v257_v31  ;;  %v274_v56 = vadd.f32 %v2227_v14, %v262_v46  ;;  %v1957_v5 = vld [vmem:[%s2678_s3 + $0x88] sm:$0xff]  ;;  %v1979_v19 = vld [vmem:[%s2678_s3 + $0x138] sm:$0xff]  ;;  %v1946_v29 = vld [vmem:[%s2678_s3 + $0x30] sm:$0xff] }
  0x15   : > { %635 = vmatpush.bf16.msra.mxu2 %v1961_v11  ;;  %v279_v32 = vmax.f32 %v271_v26, 0.0  ;;  %v280_v33 = vmax.f32 %v272_v27, 0.0  ;;  %v281_v36 = vmax.f32 %v273_v28, 0.0  ;;  %v278_v58 = vmax.f32 %v270_v44, 0.0  ;;  %v1965_v9 = vld [vmem:[%s2678_s3 + $0xc8] sm:$0xff]  ;;  %v1995_v23 = vld [vmem:[%s2678_s3 + $0x1b8] sm:$0xff]  ;;  %vm2387_vm1 = vmneg %vm308_vm0 }
  0x16   : > { %750 = vmatpush.bf16.msra.mxu3 %v1969_v17  ;;  %v276_v45 = vmax.f32 %v268_v38, 0.0  ;;  %v277_v52 = vmax.f32 %v269_v40, 0.0  ;;  %v282_v61 = vmax.f32 %v274_v56, 0.0  ;;  %v1956_v17 = vld [vmem:[%s2678_s3 + $0x80] sm:$0xff]  ;;  %v1977_v38 = vld [vmem:[%s2678_s3 + $0x128] sm:$0xff]  ;;  %vm2394_vm2 = vmpackc.low %vm2387_vm1, %vm2387_vm1 }
  0x17   : > { %v2263_v42 = vrot.slane %v279_v32, 7  ;;  %v2265_v43 = vrot.slane %v280_v33, 7  ;;  %v2269_v47 = vrot.slane %v281_v36, 7  ;;  %v2312_v6 = vrot.slane %v278_v58, 7  ;;  %v373_v18 = vld [vmem:[#allocation2 + $0x1] sm:$0xff]  ;;  %v2003_v32 = vld [vmem:[%s2678_s3 + $0x1f8] sm:$0xff]  ;;  %vm2084_vm4 = vmpackc.low %vm2387_vm1, %vm2140_vm3 }
  0x18   : > { %2049 = vmatpush.bf16.msra.mxu1 %v1952_v22  ;;  %453 = vmatpush.bf16.msra.mxu0 %v1952_v22  ;;  %v2285_v55 = vrot.slane %v276_v45, 7  ;;  %v2300_v0 = vrot.slane %v277_v52, 7  ;;  %v2305_v3 = vrot.slane %v282_v61, 7  ;;  %v556_v22 = vld [vmem:[#allocation2 + $0x2] sm:$0xff]  ;;  %v1978_v33 = vld [vmem:[%s2678_s3 + $0x130] sm:$0xff]  ;;  %v1975_v58 = vld [vmem:[%s2678_s3 + $0x118] sm:$0xff] }
  0x19   : > { %636 = vmatpush.bf16.msra.mxu2 %v1960_v25  ;;  %v312_v48 = vsel %vm308_vm0, 0.0, %v2263_v42  ;;  %v313_v49 = vsel %vm308_vm0, 0.0, %v2265_v43  ;;  %v320_v50 = vsel %vm308_vm0, %v2263_v42, 0.0  ;;  %v321_v54 = vsel %vm308_vm0, %v2265_v43, 0.0  ;;  %v1964_v28 = vld [vmem:[%s2678_s3 + $0xc0] sm:$0xff]  ;;  %v1945_v36 = vld [vmem:[%s2678_s3 + $0x28] sm:$0xff]  ;;  %vm2128_vm5 = vmpackc.low %vm2140_vm3, %vm2387_vm1 }
  0x1a   : > { %751 = vmatpush.bf16.msra.mxu3 %v1968_v34  ;;  %333 = vst [vmem:[#allocation2 + $0x40] sm:$0xff] %v312_v48  ;;  %v309_v59 = vsel %vm308_vm0, 0.0, %v2285_v55  ;;  %v317_v60 = vsel %vm308_vm0, %v2285_v55, 0.0  ;;  %v314_v63 = vsel %vm308_vm0, 0.0, %v2269_v47  ;;  %v322_v4 = vsel %vm308_vm0, %v2269_v47, 0.0  ;;  %v1994_v34 = vld [vmem:[%s2678_s3 + $0x1b0] sm:$0xff] }
  0x1b   : > { %334 = vst [vmem:[#allocation2 + $0x48] sm:$0x3] %v320_v50  ;;  %v315_v7 = vsel %vm308_vm0, 0.0, %v2305_v3  ;;  %v323_v8 = vsel %vm308_vm0, %v2305_v3, 0.0  ;;  %v310_v11 = vsel %vm308_vm0, 0.0, %v2300_v0  ;;  %v318_v16 = vsel %vm308_vm0, %v2300_v0, 0.0 }
  0x1c   : > { %2050 = vmatpush.bf16.msra.mxu1 %v1951_v37  ;;  %454 = vmatpush.bf16.msra.mxu0 %v1951_v37  ;;  %335 = vst [vmem:[#allocation2 + $0x50] sm:$0xff] %v313_v49  ;;  %v311_v20 = vsel %vm308_vm0, 0.0, %v2312_v6  ;;  %v319_v24 = vsel %vm308_vm0, %v2312_v6, 0.0  ;;  %v2002_v37 = vld [vmem:[%s2678_s3 + $0x1f0] sm:$0xff]  ;;  %v1993_v39 = vld [vmem:[%s2678_s3 + $0x1a8] sm:$0xff]  ;;  %v2076_v44 = vpack.c.bf16 %v2300_v0, %v2285_v55  ;;  %v1944_v45 = vld [vmem:[%s2678_s3 + $0x20] sm:$0xff] }
  0x1d   : > { %637 = vmatpush.bf16.msra.mxu2 %v1959_v41  ;;  %336 = vst [vmem:[#allocation2 + $0x58] sm:$0x3] %v321_v54  ;;  %v2001_v46 = vld [vmem:[%s2678_s3 + $0x1e8] sm:$0xff]  ;;  %v1976_v48 = vld [vmem:[%s2678_s3 + $0x120] sm:$0xff]  ;;  %v1943_v54 = vld [vmem:[%s2678_s3 + $0x18] sm:$0xff] }
  0x1e   : > { %752 = vmatpush.bf16.msra.mxu3 %v1967_v51  ;;  %327 = vst [vmem:[#allocation2 + $0x10] sm:$0xff] %v309_v59  ;;  %v1992_v49 = vld [vmem:[%s2678_s3 + $0x1a0] sm:$0xff] }
  0x1f   : > { %328 = vst [vmem:[#allocation2 + $0x18] sm:$0x3] %v317_v60 }
  0x20   : > { %2051 = vmatpush.bf16.msra.mxu1 %v1950_v53  ;;  %455 = vmatpush.bf16.msra.mxu0 %v1950_v53  ;;  %337 = vst [vmem:[#allocation2 + $0x60] sm:$0xff] %v314_v63  ;;  %v1974_v63 = vld [vmem:[%s2678_s3 + $0x110] sm:$0xff] }
  0x21   : > { %638 = vmatpush.bf16.msra.mxu2 %v1958_v57  ;;  %338 = vst [vmem:[#allocation2 + $0x68] sm:$0x3] %v322_v4  ;;  %v2000_v4 = vld [vmem:[%s2678_s3 + $0x1e0] sm:$0xff] }
  0x22   : > { %753 = vmatpush.bf16.msra.mxu3 %v1966_v62  ;;  %v2326_v13 = vld [vmem:[#allocation2 + $0x41] sm:$0xff]  ;;  %339 = vst [vmem:[#allocation2 + $0x70] sm:$0xff] %v315_v7  ;;  %v1942_v62 = vld [vmem:[%s2678_s3 + $0x10] sm:$0xff] }
  0x23   : > { %340 = vst [vmem:[#allocation2 + $0x78] sm:$0x3] %v323_v8  ;;  %v1990_v7 = vld [vmem:[%s2678_s3 + $0x190] sm:$0xff]  ;;  %v1973_v8 = vld [vmem:[%s2678_s3 + $0x108] sm:$0xff] }
  0x24   : > { %2052 = vmatpush.bf16.msra.mxu1 %v1949_v1  ;;  %456 = vmatpush.bf16.msra.mxu0 %v1949_v1  ;;  %v2341_v21 = vld [vmem:[#allocation2 + $0x51] sm:$0xff]  ;;  %329 = vst [vmem:[#allocation2 + $0x20] sm:$0xff] %v310_v11  ;;  %v2081_v11 = vpack.c.bf16 %v2263_v42, %v2312_v6 }
  0x25   : > { %639 = vmatpush.bf16.msra.mxu2 %v1957_v5  ;;  %v2350_v25 = vpack.c.bf16 %v2341_v21, %v2326_v13  ;;  %330 = vst [vmem:[#allocation2 + $0x28] sm:$0x3] %v318_v16  ;;  %v1991_v1 = vld [vmem:[%s2678_s3 + $0x198] sm:$0xff]  ;;  %v1941_v5 = vld [vmem:[%s2678_s3 + $0x8] sm:$0xff]  ;;  %v1972_v16 = vld [vmem:[%s2678_s3 + $0x100] sm:$0xff] }
  0x26   : > { %754 = vmatpush.bf16.msra.mxu3 %v1965_v9  ;;  %v2352_v26 = vld [vmem:[#allocation2 + $0x11] sm:$0xff]  ;;  %331 = vst [vmem:[#allocation2 + $0x30] sm:$0xff] %v311_v20 }
  0x27   : > { %v2354_v27 = vld [vmem:[#allocation2 + $0x12] sm:$0xff]  ;;  %v381_v30 = vpack.c.bf16 %v2352_v26, %v373_v18  ;;  %332 = vst [vmem:[#allocation2 + $0x38] sm:$0x3] %v319_v24  ;;  %v2027_v18 = vunpack.c.h.bf16 %v2252_v35 }
  0x28   : > { %2053 = vmatpush.bf16.msra.mxu1 %v1948_v12  ;;  %457 = vmatpush.bf16.msra.mxu0 %v1948_v12  ;;  %v564_v31 = vpack.c.bf16 %v2354_v27, %v556_v22  ;;  %v2414_v50 = vld [vmem:[#allocation2 + $0x61] sm:$0xff]  ;;  %v1999_v9 = vld [vmem:[%s2678_s3 + $0x1d8] sm:$0xff]  ;;  %v1986_v22 = vld [vmem:[%s2678_s3 + $0x170] sm:$0xff] }
  0x29   : > { %640 = vmatpush.bf16.msra.mxu2 %v1956_v17  ;;  %v1940_v12 = vld [vmem:[%s2678_s3] sm:$0xff]  ;;  %v2011_v17 = vld [vmem:[%s2678_s3 + $0x238] sm:$0xff]  ;;  %v2010_v35 = vld [vmem:[%s2678_s3 + $0x230] sm:$0xff] }
  0x2a   : > { %755 = vmatpush.bf16.msra.mxu3 %v1964_v28  ;;  %v2416_v51 = vld [vmem:[#allocation2 + $0x71] sm:$0xff] }
  0x2b   : > { %468 = vmatmul.bf16.vlgmr.msra.gmra.mxu1 %v2350_v25  ;;  %458 = vmatmul.bf16.vlgmr.msra.gmra.mxu0 %v381_v30  ;;  %v2432_v59 = vpack.c.bf16 %v2416_v51, %v2414_v50  ;;  %v2487_v20 = vld [vmem:[#allocation2 + $0x52] sm:$0xff]  ;;  %v1985_v30 = vld [vmem:[%s2678_s3 + $0x168] sm:$0xff] }
  0x2c   : > { %527 = vmatpush.bf16.msrb.mxu1 %v1947_v15  ;;  %862 = vmatpush.bf16.msrb.mxu0 %v1979_v19  ;;  %v375_v52 = vld [vmem:[#allocation2 + $0x21] sm:$0xff]  ;;  %v1987_v15 = vld [vmem:[%s2678_s3 + $0x178] sm:$0xff] }
  0x2d   : > { %1091 = vmatpush.bf16.msrb.mxu2 %v1995_v23  ;;  %2077 = vmatmul.msk.bf16.vlgmr.msra.gmra.mxu3 %vm2394_vm2, %v2076_v44  ;;  %v2423_v56 = vld [vmem:[#allocation2 + $0x22] sm:$0xff]  ;;  %v263_v23 = vmul.f32 %v2219_v10, %v2027_v18  ;;  %v793_v24 = vpack.c.bf16 %v375_v52, %v2352_v26 }
  0x2e   : > { %641 = vmatmul.bf16.vlgmr.msra.gmra.mxu2 %v564_v31  ;;  %1205 = vmatpush.bf16.msrb.mxu3 %v2003_v32  ;;  %v2418_v53 = vld [vmem:[#allocation2 + $0x31] sm:$0xff]  ;;  %v2485_v19 = vld [vmem:[#allocation2 + $0x42] sm:$0xff]  ;;  %v2085_v31 = vpack.c.bf16 %v2285_v55, %v2139_v2 }
  0x2f   : > { %v2425_v57 = vld [vmem:[#allocation2 + $0x32] sm:$0xff]  ;;  %v2435_v60 = vpack.c.bf16 %v2418_v53, %v375_v52  ;;  %v2496_v28 = vpack.c.bf16 %v2487_v20, %v2485_v19  ;;  %v1989_v10 = vld [vmem:[%s2678_s3 + $0x188] sm:$0xff]  ;;  %v1988_v2 = vld [vmem:[%s2678_s3 + $0x180] sm:$0xff] }
  0x30   : > { %528 = vmatpush.bf16.msrb.mxu1 %v1946_v29  ;;  %863 = vmatpush.bf16.msrb.mxu0 %v1978_v33  ;;  %v2439_v61 = vpack.c.bf16 %v2425_v57, %v2423_v56  ;;  %v275_v29 = vadd.f32 %v2227_v14, %v263_v23  ;;  %v2009_v14 = vld [vmem:[%s2678_s3 + $0x228] sm:$0xff]  ;;  %v1998_v33 = vld [vmem:[%s2678_s3 + $0x1d0] sm:$0xff]  ;;  %v1984_v55 = vld [vmem:[%s2678_s3 + $0x160] sm:$0xff] }
  0x31   : > { %1092 = vmatpush.bf16.msrb.mxu2 %v1994_v34  ;;  %v2543_v44 = vld [vmem:[#allocation2 + $0x62] sm:$0xff] }
  0x32   : > { %1206 = vmatpush.bf16.msrb.mxu3 %v2002_v37  ;;  %v283_v26 = vmax.f32 %v275_v29, 0.0  ;;  %v2090_v37 = vpack.c.bf16 %v2269_v47, %v2265_v43  ;;  %v909_v41 = vpack.c.bf16 %v2543_v44, %v2487_v20 }
  0x34   : > { %529 = vmatpush.bf16.msrb.mxu1 %v1945_v36  ;;  %864 = vmatpush.bf16.msrb.mxu0 %v1977_v38  ;;  %v2517_v32 = vrot.slane %v283_v26, 7  ;;  %v1997_v36 = vld [vmem:[%s2678_s3 + $0x1c8] sm:$0xff]  ;;  %v2008_v38 = vld [vmem:[%s2678_s3 + $0x220] sm:$0xff] }
  0x35   : > { %1093 = vmatpush.bf16.msrb.mxu2 %v1993_v39  ;;  %v1983_v39 = vld [vmem:[%s2678_s3 + $0x158] sm:$0xff] }
  0x36   : > { %1207 = vmatpush.bf16.msrb.mxu3 %v2001_v46  ;;  %v316_v34 = vsel %vm308_vm0, 0.0, %v2517_v32  ;;  %v1982_v46 = vld [vmem:[%s2678_s3 + $0x150] sm:$0xff] }
  0x37   : > { %341 = vst [vmem:[#allocation2 + $0x80] sm:$0xff] %v316_v34 }
  0x38   : > { %530 = vmatpush.bf16.msrb.mxu1 %v1944_v45  ;;  %865 = vmatpush.bf16.msrb.mxu0 %v1976_v48  ;;  %v2545_v45 = vld [vmem:[#allocation2 + $0x72] sm:$0xff]  ;;  %v324_v48 = vsel %vm308_vm0, %v2517_v32, 0.0 }
  0x39   : > { %1094 = vmatpush.bf16.msrb.mxu2 %v1992_v49  ;;  %v794_v49 = vpack.c.bf16 %v2326_v13, %v2418_v53  ;;  %342 = vst [vmem:[#allocation2 + $0x88] sm:$0x3] %v324_v48  ;;  %v567_v52 = vpack.c.bf16 %v2545_v45, %v2543_v44  ;;  %v2007_v13 = vld [vmem:[%s2678_s3 + $0x218] sm:$0xff]  ;;  %v1996_v53 = vld [vmem:[%s2678_s3 + $0x1c0] sm:$0xff] }
  0x3a   : > { %1208 = vmatpush.bf16.msrb.mxu3 %v2000_v4  ;;  %v2004_v4 = vld [vmem:[%s2678_s3 + $0x200] sm:$0xff] }
  0x3b   : > { %473 = vmatmul.bf16.gmra.mxu1 %v2432_v59  ;;  %463 = vmatmul.bf16.gmra.mxu0 %v2435_v60 }
  0x3c   : > { %531 = vmatpush.bf16.msrb.mxu1 %v1943_v54  ;;  %866 = vmatpush.bf16.msrb.mxu0 %v1975_v58  ;;  %v2095_v54 = vpack.c.bf16 %v2312_v6, %v2300_v0  ;;  %v1981_v58 = vld [vmem:[%s2678_s3 + $0x148] sm:$0xff]  ;;  %v907_v0 = vpack.c.bf16 %v2423_v56, %v2354_v27  ;;  %v2006_v6 = vld [vmem:[%s2678_s3 + $0x210] sm:$0xff]  ;;  %v795_v56 = vpack.c.bf16 %v2414_v50, %v2341_v21 }
  0x3d   : > { %1095 = vmatpush.bf16.msrb.mxu2 %v1991_v1  ;;  %2082 = vmatmul.msk.bf16.gmra.mxu3 %vm2394_vm2, %v2081_v11  ;;  %v2005_v27 = vld [vmem:[%s2678_s3 + $0x208] sm:$0xff]  ;;  %v2105_v1 = vpack.c.bf16 %v2265_v43, %v2263_v42  ;;  %v2115_v21 = vpack.c.bf16 %v2305_v3, %v2269_v47  ;;  %v1135_v50 = vld [vmem:[#allocation2 + $0x91] sm:$0xff] }
  0x3e   : > { %646 = vmatmul.bf16.gmra.mxu2 %v2439_v61  ;;  %1209 = vmatpush.bf16.msrb.mxu3 %v1999_v9 }
  0x40   : > { %532 = vmatpush.bf16.msrb.mxu1 %v1942_v62  ;;  %867 = vmatpush.bf16.msrb.mxu0 %v1974_v63  ;;  %v1980_v62 = vld [vmem:[%s2678_s3 + $0x140] sm:$0xff]  ;;  %v2100_v63 = vpack.c.bf16 %v2517_v32, %v2305_v3  ;;  %v2129_v3 = vpack.c.bf16 0.0, %v2517_v32 }
  0x41   : > { %1096 = vmatpush.bf16.msrb.mxu2 %v1990_v7  ;;  %v792_v42 = vld [vmem:[#allocation2 + $0x81] sm:$0xff] }
  0x42   : > { %1210 = vmatpush.bf16.msrb.mxu3 %v1998_v33  ;;  %v796_v43 = vpack.c.bf16 %v792_v42, %v2416_v51  ;;  %v1139_v47 = vpack.c.bf16 %v1135_v50, %v792_v42  ;;  %v1249_v51 = vld [vmem:[#allocation2 + $0x92] sm:$0xff] }
  0x44   : > { %533 = vmatpush.bf16.msrb.mxu1 %v1941_v5  ;;  %868 = vmatpush.bf16.msrb.mxu0 %v1973_v8  ;;  %v908_v5 = vpack.c.bf16 %v2485_v19, %v2425_v57 }
  0x45   : > { %1097 = vmatpush.bf16.msrb.mxu2 %v1989_v10 }
  0x46   : > { %1211 = vmatpush.bf16.msrb.mxu3 %v1997_v36 }
  0x48   : > { %534 = vmatpush.bf16.msrb.mxu1 %v1940_v12  ;;  %869 = vmatpush.bf16.msrb.mxu0 %v1972_v16 }
  0x49   : > { %1098 = vmatpush.bf16.msrb.mxu2 %v1988_v2 }
  0x4a   : > { %1212 = vmatpush.bf16.msrb.mxu3 %v1996_v53 }
  0x4b   : > { %2086 = vmatmul.msk.bf16.vlgmr.msrb.gmra.mxu1 %vm2084_vm4, %v2085_v31  ;;  %870 = vmatmul.bf16.vlgmr.msrb.gmra.mxu0 %v793_v24 }
  0x4c   : > { %976 = vmatpush.bf16.msra.mxu1 %v1987_v15  ;;  %1319 = vmatpush.bf16.msra.mxu0 %v2011_v17 }
  0x4d   : > { %2091 = vmatmul.msk.bf16.gmra.mxu3 %vm2394_vm2, %v2090_v37  ;;  %2054 = vmatpush.bf16.msra.mxu2 %v2011_v17 }
  0x4e   : > { %651 = vmatmul.bf16.gmra.mxu2 %v2496_v28 }
  0x50   : > { %977 = vmatpush.bf16.msra.mxu1 %v1986_v22  ;;  %1320 = vmatpush.bf16.msra.mxu0 %v2010_v35 }
  0x51   : > { %2055 = vmatpush.bf16.msra.mxu2 %v2010_v35 }
  0x54   : > { %978 = vmatpush.bf16.msra.mxu1 %v1985_v30  ;;  %1321 = vmatpush.bf16.msra.mxu0 %v2009_v14 }
  0x55   : > { %2056 = vmatpush.bf16.msra.mxu2 %v2009_v14 }
  0x58   : > { %979 = vmatpush.bf16.msra.mxu1 %v1984_v55  ;;  %1322 = vmatpush.bf16.msra.mxu0 %v2008_v38 }
  0x59   : > { %2057 = vmatpush.bf16.msra.mxu2 %v2008_v38 }
  0x5b   : > { %2096 = vmatmul.msk.bf16.gmra.mxu1 %vm2394_vm2, %v2095_v54  ;;  %875 = vmatmul.bf16.gmra.mxu0 %v794_v49 }
  0x5c   : > { %980 = vmatpush.bf16.msra.mxu1 %v1983_v39  ;;  %1323 = vmatpush.bf16.msra.mxu0 %v2007_v13 }
  0x5d   : > { %2101 = vmatmul.msk.bf16.gmra.mxu3 %vm2394_vm2, %v2100_v63  ;;  %2058 = vmatpush.bf16.msra.mxu2 %v2007_v13 }
  0x5e   : > { %656 = vmatmul.bf16.gmra.mxu2 %v567_v52 }
  0x60   : > { %981 = vmatpush.bf16.msra.mxu1 %v1982_v46  ;;  %1324 = vmatpush.bf16.msra.mxu0 %v2006_v6 }
  0x61   : > { %2059 = vmatpush.bf16.msra.mxu2 %v2006_v6 }
  0x64   : > { %982 = vmatpush.bf16.msra.mxu1 %v1981_v58  ;;  %1325 = vmatpush.bf16.msra.mxu0 %v2005_v27 }
  0x65   : > { %2060 = vmatpush.bf16.msra.mxu2 %v2005_v27 }
  0x68   : > { %983 = vmatpush.bf16.msra.mxu1 %v1980_v62  ;;  %1326 = vmatpush.bf16.msra.mxu0 %v2004_v4 }
  0x69   : > { %2061 = vmatpush.bf16.msra.mxu2 %v2004_v4 }
  0x6b   : > { %2106 = vmatmul.msk.bf16.gmra.mxu1 %vm2394_vm2, %v2105_v1  ;;  %880 = vmatmul.bf16.gmra.mxu0 %v795_v56 }
  0x6d   : > { %1213 = vmatmul.bf16.vlgmr.msrb.gmra.mxu3 %v2435_v60 }
  0x6e   : > { %2111 = vmatmul.msk.bf16.vlgmr.msrb.gmra.mxu2 %vm2394_vm2, %v2095_v54 }
  0x7b   : > { %2116 = vmatmul.msk.bf16.gmra.mxu1 %vm2394_vm2, %v2115_v21  ;;  %885 = vmatmul.bf16.gmra.mxu0 %v796_v43 }
  0x7d   : > { %1218 = vmatmul.bf16.gmra.mxu3 %v2350_v25  ;;  %v1248_v25 = vld [vmem:[#allocation2 + $0x82] sm:$0xff] }
  0x7e   : > { %2121 = vmatmul.msk.bf16.gmra.mxu2 %vm2394_vm2, %v2105_v1  ;;  %v1253_v60 = vpack.c.bf16 %v1249_v51, %v1248_v25  ;;  %v910_v9 = vpack.c.bf16 %v1248_v25, %v2545_v45 }
  0x8b   : > { %984 = vmatmul.bf16.vlgmr.msra.gmra.mxu1 %v907_v0  ;;  %1327 = vmatmul.bf16.vlgmr.msra.gmra.mxu0 %v2439_v61 }
  0x8d   : > { %1223 = vmatmul.bf16.gmra.mxu3 %v2432_v59 }
  0x8e   : > { %2126 = vmatmul.msk.bf16.gmra.mxu2 %vm2394_vm2, %v2115_v21 }
  0x9b   : > { %989 = vmatmul.bf16.gmra.mxu1 %v908_v5  ;;  %1332 = vmatmul.bf16.gmra.mxu0 %v2496_v28 }
  0x9d   : > { %1228 = vmatmul.bf16.gmra.mxu3 %v1139_v47 }
  0x9e   : > { %2130 = vmatmul.msk.bf16.gmra.mxu2 %vm2128_vm5, %v2129_v3 }
  0xa8   : > { %v469_v57 = vpop.f32.mrf.mxu1  ;;  %v459_v59 = vpop.f32.mrf.mxu0 }
  0xab   : > { %994 = vmatmul.bf16.gmra.mxu1 %v909_v41  ;;  %1337 = vmatmul.bf16.gmra.mxu0 %v567_v52 }
  0xae   : > { %1342 = vmatmul.bf16.vlgmr.msra.gmra.mxu2 %v1253_v60 }
  0xb0   : > { %v471_v7 = vpop.f32.mrf.mxu1  ;;  %v461_v40 = vpop.f32.mrf.mxu0 }
  0xb1   : > { %v642_v61 = vpop.f32.mrf.mxu2  ;;  %v757_v8 = vpop.f32.mrf.mxu3 }
  0xb8   : > { %v474_v12 = vpop.f32.mrf.mxu1  ;;  %v464_v15 = vpop.f32.mrf.mxu0 }
  0xb9   : > { %v644_v11 = vpop.f32.mrf.mxu2  ;;  %v2618_v16 = vpop.f32.mrf.mxu3 }
  0xbb   : > { %999 = vmatmul.bf16.gmra.mxu1 %v910_v9 }
  0xc0   : > { %v476_v18 = vpop.f32.mrf.mxu1  ;;  %v466_v19 = vpop.f32.mrf.mxu0 }
  0xc1   : > { %v647_v17 = vpop.f32.mrf.mxu2  ;;  %v762_v20 = vpop.f32.mrf.mxu3 }
  0xc8   : > { %v536_v23 = vpop.f32.mrf.mxu1  ;;  %v871_v24 = vpop.f32.mrf.mxu0 }
  0xc9   : > { %v649_v22 = vpop.f32.mrf.mxu2  ;;  %v537_v28 = vadd.f32 %v536_v23, %v459_v59  ;;  %v2620_v29 = vpop.f32.mrf.mxu3 }
  0xcb   : > { %v662_v35 = vadd.f32 %v642_v61, %v537_v28 }
  0xcd   : > { %v777_v30 = vadd.f32 %v757_v8, %v662_v35 }
  0xcf   : > { %v891_v10 = vadd.f32 %v871_v24, %v777_v30 }
  0xd0   : > { %v538_v31 = vpop.f32.mrf.mxu1  ;;  %v873_v14 = vpop.f32.mrf.mxu0 }
  0xd1   : > { %v652_v26 = vpop.f32.mrf.mxu2  ;;  %v539_v32 = vadd.f32 %v538_v31, %v461_v40  ;;  %v767_v2 = vpop.f32.mrf.mxu3 }
  0xd3   : > { %v663_v33 = vadd.f32 %v644_v11, %v539_v32 }
  0xd8   : > { %v541_v34 = vpop.f32.mrf.mxu1  ;;  %v876_v36 = vpop.f32.mrf.mxu0 }
  0xd9   : > { %v654_v55 = vpop.f32.mrf.mxu2  ;;  %v542_v37 = vadd.f32 %v541_v34, %v464_v15  ;;  %v2622_v46 = vpop.f32.mrf.mxu3  ;;  %v778_v15 = vadd.f32 %v2618_v16, %v663_v33 }
  0xdb   : > { %v664_v38 = vadd.f32 %v647_v17, %v542_v37 }
  0xdd   : > { %v779_v39 = vadd.f32 %v762_v20, %v664_v38 }
  0xdf   : > { %v893_v44 = vadd.f32 %v876_v36, %v779_v39 }
  0xe0   : > { %v543_v48 = vpop.f32.mrf.mxu1  ;;  %v2624_v49 = vpop.f32.mrf.mxu0 }
  0xe1   : > { %v657_v45 = vpop.f32.mrf.mxu2  ;;  %v544_v52 = vadd.f32 %v543_v48, %v466_v19  ;;  %v2626_v6 = vpop.f32.mrf.mxu3 }
  0xe3   : > { %v665_v54 = vadd.f32 %v649_v22, %v544_v52 }
  0xe5   : > { %v780_v16 = vadd.f32 %v2620_v29, %v665_v54 }
  0xe8   : > { %v546_v13 = vpop.f32.mrf.mxu1  ;;  %v881_v53 = vpop.f32.mrf.mxu0 }
  0xe9   : > { %v659_v58 = vpop.f32.mrf.mxu2  ;;  %v547_v0 = vadd.f32 %v546_v13, %v469_v57  ;;  %v2634_v43 = vpop.f32.mrf.mxu3 }
  0xeb   : > { %v666_v62 = vadd.f32 %v652_v26, %v547_v0 }
  0xed   : > { %v781_v63 = vadd.f32 %v767_v2, %v666_v62 }
  0xef   : > { %v2628_v27 = vadd.f32 %v881_v53, %v781_v63 }
  0xf0   : > { %v548_v1 = vpop.f32.mrf.mxu1  ;;  %v2630_v4 = vpop.f32.mrf.mxu0 }
  0xf1   : > { %v1100_v56 = vpop.f32.mrf.mxu2  ;;  %v549_v5 = vadd.f32 %v548_v1, %v471_v7  ;;  %v1214_v51 = vpop.f32.mrf.mxu3 }
  0xf3   : > { %v2632_v42 = vadd.f32 %v654_v55, %v549_v5 }
  0xf8   : > { %v551_v50 = vpop.f32.mrf.mxu1  ;;  %v2636_v47 = vpop.f32.mrf.mxu0 }
  0xf9   : > { %v1102_v21 = vpop.f32.mrf.mxu2  ;;  %v552_v3 = vadd.f32 %v551_v50, %v474_v12  ;;  %v1216_v7 = vpop.f32.mrf.mxu3  ;;  %v892_v12 = vadd.f32 %v873_v14, %v778_v15 }
  0xfb   : > { %v2638_v25 = vadd.f32 %v657_v45, %v552_v3 }
 0x100   : > { %v553_v57 = vpop.f32.mrf.mxu1  ;;  %v2640_v59 = vpop.f32.mrf.mxu0 }
 0x101   : > { %v1105_v41 = vpop.f32.mrf.mxu2  ;;  %v554_v60 = vadd.f32 %v553_v57, %v476_v18  ;;  %v1219_v28 = vpop.f32.mrf.mxu3 }
 0x103   : > { %v2642_v61 = vadd.f32 %v659_v58, %v554_v60 }
 0x108   : > { %v985_v40 = vpop.f32.mrf.mxu1  ;;  %v1328_v8 = vpop.f32.mrf.mxu0 }
 0x109   : > { %v1005_v9 = vadd.f32 %v985_v40, %v891_v10  ;;  %v1107_v11 = vpop.f32.mrf.mxu2  ;;  %v1221_v37 = vpop.f32.mrf.mxu3 }
 0x10b   : > { %v1120_v17 = vadd.f32 %v1100_v56, %v1005_v9 }
 0x10d   : > { %v1234_v19 = vadd.f32 %v1214_v51, %v1120_v17 }
 0x10f   : > { %v1348_v20 = vadd.f32 %v1328_v8, %v1234_v19 }
 0x110   : > { %v987_v22 = vpop.f32.mrf.mxu1  ;;  %v1330_v23 = vpop.f32.mrf.mxu0 }
 0x111   : > { %v1006_v24 = vadd.f32 %v987_v22, %v892_v12  ;;  %v1356_v18 = vpack.c.bf16 %v1348_v20, %v1348_v20  ;;  %v1110_v30 = vpop.f32.mrf.mxu2 }
 0x113   : > { %v1121_v35 = vadd.f32 %v1102_v21, %v1006_v24  ;;  %v1364_v32 = vunpack.c.l.bf16 %v1356_v18  ;;  %v1224_v21 = vpop.f32.mrf.mxu3 }
 0x115   : > { %v1235_v26 = vadd.f32 %v1216_v7, %v1121_v35  ;;  %v1402_v36 = vmul.f32 %v1364_v32, %v1364_v32  ;;  %v782_v7 = vadd.f32 %v2622_v46, %v2632_v42  ;;  %v783_v35 = vadd.f32 %v2626_v6, %v2638_v25 }
 0x117   : > { %v1349_v31 = vadd.f32 %v1330_v23, %v1235_v26  ;;  %v896_v19 = vadd.f32 %v2630_v4, %v782_v7 }
 0x118   : > { %v990_v2 = vpop.f32.mrf.mxu1  ;;  %v1333_v10 = vpop.f32.mrf.mxu0 }
 0x119   : > { %v1357_v55 = vpack.c.bf16 %v1349_v31, %v1349_v31  ;;  %v1007_v34 = vadd.f32 %v990_v2, %v893_v44  ;;  %v1112_v52 = vpop.f32.mrf.mxu2  ;;  %v894_v44 = vadd.f32 %v2624_v49, %v780_v16 }
 0x11b   : > { %v1365_v33 = vunpack.c.l.bf16 %v1357_v55  ;;  %v1122_v14 = vadd.f32 %v1105_v41, %v1007_v34  ;;  %v1226_v22 = vpop.f32.mrf.mxu3 }
 0x11d   : > { %v2029_v38 = vpack.c.bf16 %v1365_v33, %v1364_v32  ;;  %v1388_v39 = vadd.f32 %v1365_v33, %v1364_v32  ;;  %v1403_v45 = vmul.f32 %v1365_v33, %v1365_v33  ;;  %v1236_v48 = vadd.f32 %v1219_v28, %v1122_v14 }
 0x11e   : > { %v897_v32 = vadd.f32 %v2636_v47, %v783_v35  ;;  %v784_v33 = vadd.f32 %v2634_v43, %v2642_v61 }
 0x11f   : > { %2030 = vst [vmem:[%s2651_s17] sm:$0xff] %v2029_v38   ;;  %v1410_v29 = vadd.f32 %v1403_v45, %v1402_v36  ;;  %v1350_v54 = vadd.f32 %v1333_v10, %v1236_v48 }
 0x120   : > { %v992_v58 = vpop.f32.mrf.mxu1  ;;  %v1335_v13 = vpop.f32.mrf.mxu0  ;;  %v898_v45 = vadd.f32 %v2640_v59, %v784_v33 }
 0x121   : > { %v1358_v53 = vpack.c.bf16 %v1350_v54, %v1350_v54  ;;  %v1008_v0 = vadd.f32 %v992_v58, %v894_v44  ;;  %v1115_v51 = vpop.f32.mrf.mxu2 }
 0x123   : > { %v1366_v62 = vunpack.c.l.bf16 %v1358_v53  ;;  %v1123_v63 = vadd.f32 %v1107_v11, %v1008_v0  ;;  %v1229_v16 = vpop.f32.mrf.mxu3 }
 0x125   : > { %v1389_v56 = vadd.f32 %v1388_v39, %v1366_v62  ;;  %v1404_v1 = vmul.f32 %v1366_v62, %v1366_v62  ;;  %v1237_v5 = vadd.f32 %v1221_v37, %v1123_v63 }
 0x127   : > { %v1411_v50 = vadd.f32 %v1410_v29, %v1404_v1  ;;  %v1351_v3 = vadd.f32 %v1335_v13, %v1237_v5 }
 0x128   : > { %v995_v41 = vpop.f32.mrf.mxu1  ;;  %v1338_v60 = vpop.f32.mrf.mxu0 }
 0x129   : > { %v1359_v57 = vpack.c.bf16 %v1351_v3, %v1351_v3  ;;  %v1009_v49 = vadd.f32 %v995_v41, %v2628_v27  ;;  %v1117_v27 = vpop.f32.mrf.mxu2 }
 0x12b   : > { %v1367_v40 = vunpack.c.l.bf16 %v1359_v57  ;;  %v1124_v8 = vadd.f32 %v1110_v30, %v1009_v49  ;;  %v1231_v13 = vpop.f32.mrf.mxu3 }
 0x12d   : > { %v2032_v9 = vpack.c.bf16 %v1367_v40, %v1366_v62  ;;  %v1390_v11 = vadd.f32 %v1389_v56, %v1367_v40  ;;  %v1405_v15 = vmul.f32 %v1367_v40, %v1367_v40  ;;  %v1238_v17 = vadd.f32 %v1224_v21, %v1124_v8 }
 0x12f   : > { %2043 = vst [vmem:[%s2651_s17 + $0x8] sm:$0xff] %v2032_v9   ;;  %v1412_v12 = vadd.f32 %v1411_v50, %v1405_v15  ;;  %v1352_v20 = vadd.f32 %v1338_v60, %v1238_v17 }
 0x130   : > { %v997_v23 = vpop.f32.mrf.mxu1  ;;  %v1340_v18 = vpop.f32.mrf.mxu0 }
 0x131   : > { %v1360_v24 = vpack.c.bf16 %v1352_v20, %v1352_v20  ;;  %v1010_v28 = vadd.f32 %v997_v23, %v896_v19  ;;  %v1343_v25 = vpop.f32.mrf.mxu2 }
 0x133   : > { %v1368_v46 = vunpack.c.l.bf16 %v1360_v24  ;;  %v1125_v42 = vadd.f32 %v1112_v52, %v1010_v28 }
 0x135   : > { %v1391_v30 = vadd.f32 %v1390_v11, %v1368_v46  ;;  %v1406_v26 = vmul.f32 %v1368_v46, %v1368_v46  ;;  %v1239_v31 = vadd.f32 %v1226_v22, %v1125_v42 }
 0x137   : > { %v1413_v4 = vadd.f32 %v1412_v12, %v1406_v26  ;;  %v1353_v2 = vadd.f32 %v1340_v18, %v1239_v31 }
 0x138   : > { %v1000_v10 = vpop.f32.mrf.mxu1 }
 0x139   : > { %v1361_v55 = vpack.c.bf16 %v1353_v2, %v1353_v2  ;;  %v1011_v34 = vadd.f32 %v1000_v10, %v897_v32  ;;  %v1345_v0 = vpop.f32.mrf.mxu2 }
 0x13b   : > { %v1369_v14 = vunpack.c.l.bf16 %v1361_v55  ;;  %v1126_v6 = vadd.f32 %v1115_v51, %v1011_v34 }
 0x13d   : > { %v2035_v36 = vpack.c.bf16 %v1369_v14, %v1368_v46  ;;  %v1392_v37 = vadd.f32 %v1391_v30, %v1369_v14  ;;  %v1407_v38 = vmul.f32 %v1369_v14, %v1369_v14  ;;  %v1240_v39 = vadd.f32 %v1229_v16, %v1126_v6 }
 0x13f   : > { %2044 = vst [vmem:[%s2651_s17 + $0x10] sm:$0xff] %v2035_v36   ;;  %v1414_v47 = vadd.f32 %v1413_v4, %v1407_v38  ;;  %v1354_v48 = vadd.f32 %v1343_v25, %v1240_v39 }
 0x140   : > { %v1002_v52 = vpop.f32.mrf.mxu1 }
 0x141   : > { %v1362_v44 = vpack.c.bf16 %v1354_v48, %v1354_v48  ;;  %v1012_v29 = vadd.f32 %v1002_v52, %v898_v45 }
 0x143   : > { %v1370_v54 = vunpack.c.l.bf16 %v1362_v44  ;;  %v1127_v58 = vadd.f32 %v1117_v27, %v1012_v29 }
 0x145   : > { %v1393_v43 = vadd.f32 %v1392_v37, %v1370_v54  ;;  %v1408_v61 = vmul.f32 %v1370_v54, %v1370_v54  ;;  %v1241_v53 = vadd.f32 %v1231_v13, %v1127_v58 }
 0x147   : > { %v1415_v62 = vadd.f32 %v1414_v47, %v1408_v61  ;;  %v1355_v63 = vadd.f32 %v1345_v0, %v1241_v53 }
 0x149   : > { %v1363_v56 = vpack.c.bf16 %v1355_v63, %v1355_v63 }
 0x14b   : > { %v1371_v1 = vunpack.c.l.bf16 %v1363_v56 }
 0x14d   : > { %v2038_v59 = vpack.c.bf16 %v1371_v1, %v1370_v54  ;;  %v1394_v5 = vadd.f32 %v1393_v43, %v1371_v1  ;;  %v1409_v21 = vmul.f32 %v1371_v1, %v1371_v1 }
 0x14f   : > { %2045 = vst [vmem:[%s2651_s17 + $0x18] sm:$0xff] %v2038_v59   ;;  %v1395_v50 = vrot.slane %v1394_v5, 4  ;;  %v1416_v3 = vadd.f32 %v1415_v62, %v1409_v21 }
 0x151   : > { %v1396_v51 = vadd.f32 %v1395_v50, %v1394_v5  ;;  %v1417_v41 = vrot.slane %v1416_v3, 4 }
 0x153   : > { %v1397_v57 = vrot.slane %v1396_v51, 2  ;;  %v1418_v49 = vadd.f32 %v1417_v41, %v1416_v3 }
 0x155   : > { %v1398_v60 = vadd.f32 %v1397_v57, %v1396_v51  ;;  %v1419_v7 = vrot.slane %v1418_v49, 2 }
 0x157   : > { %v1399_v40 = vrot.slane %v1398_v60, 1  ;;  %v1420_v8 = vadd.f32 %v1419_v7, %v1418_v49 }
 0x159   : > { %v1400_v9 = vadd.f32 %v1399_v40, %v1398_v60  ;;  %v1421_v11 = vrot.slane %v1420_v8, 1 }
 0x15b   : > { %1401 = vst [vmem:[%s235_s22] sm:$0x1] %v1400_v9  ;;  %v1422_v15 = vadd.f32 %v1421_v11, %v1420_v8 }
 0x15d   : > { %1423 = vst [vmem:[%s235_s22 + $0x1] sm:$0x1] %v1422_v15 }
 0x15e PF: > { %s16_s18 = sadd.s32 1, %s2137_s18  }
 0x15f   : > { %p13_p4 = scmp.ge.s32.totalorder %s16_s18, 4  }
 0x161   :  { %15 = sbr.rel (!%p13_p4) target bundleno = 1 (0x1), region = 88 }

</bundles_post_ra>
